<compile_context>
chip_gen: v7x
topology: tpu7x:2x2x1
jax: 0.10.0
libtpu: 0.0.40
codegen_flags: <defaults>
</compile_context>

<pallas_src>
import functools

import jax
import jax.numpy as jnp
from jax.experimental import pallas as pl
from jax.experimental.pallas import tpu as pltpu


def _round_up(n, m):
    return ((n + m - 1) // m) * m


def _fused_subspace_mlp_kernel(theta_ref, x_ref, w1_ref, b1_ref, w2_ref, b2_ref,
                               o_ref, acc_ref, *, kblk, d_aug):
    """Fused Flatten -> SubspaceLinear(in,h) -> ReLU -> SubspaceLinear(h,out).

    Grid: 1-D reduction over K-tiles of the *augmented* layer-1 contraction dimension
    (dint+1 stacked basis matrices, kblk of them per grid step).

    theta_ref : SMEM (d_pad,)            f32   [1, theta_0..theta_{dint-1}, 0-pad]
    x_ref     : VMEM (B, in_f)           f32   flattened input (resident, same block every step)
    w1_ref    : VMEM (kblk*in_f, h)      bf16  current K-tile of stacked [W0_1; Pw1] (pipelined)
    b1_ref    : VMEM (d_aug, h)          bf16  stacked [b0_1; Pb1]           (resident)
    w2_ref    : VMEM (d_aug*h, o_pad)    bf16  stacked+flattened [W0_2; Pw2] (resident)
    b2_ref    : VMEM (d_aug, o_pad)      bf16  stacked [b0_2; Pb2]           (resident)
    o_ref     : VMEM (B, o_pad)          f32   lane-padded output (sliced in wrapper)
    acc_ref   : VMEM (B, h)              f32   layer-1 accumulator scratch
    """
    k = pl.program_id(0)
    in_f = x_ref.shape[1]
    hid = acc_ref.shape[1]

    @pl.when(k == 0)
    def _init():
        acc_ref[...] = jnp.zeros_like(acc_ref)

    # ---- layer 1 partials: kblk accumulating MXU dots on this K-tile --------------------
    # Each basis matrix W_d contributes theta_d * (x @ W_d); the scale is applied to the tiny
    # (B, in_f) LHS on the VPU (f32 mul, then bf16 cast for the MXU).
    x = x_ref[...]                                               # (B, in_f) f32
    acc = acc_ref[...]
    for j in range(kblk):                                        # kblk is static -> unrolled
        xs = (theta_ref[k * kblk + j] * x).astype(w1_ref.dtype)  # (B, in_f) bf16
        acc = acc + jnp.dot(xs, w1_ref[pl.ds(j * in_f, in_f), :],
                            preferred_element_type=jnp.float32)
    acc_ref[...] = acc

    # ---- epilogue: bias1 + ReLU + the (tiny, VMEM-resident) second subspace linear ------
    @pl.when(k == pl.num_programs(0) - 1)
    def _epilogue():
        # effective bias 1: b0_1 + sum_d theta_d * Pb1[d]   (d_aug axpys on one (1,h) vreg row)
        b1 = jnp.zeros((1, hid), jnp.float32)
        for d in range(d_aug):
            b1 = b1 + theta_ref[d] * b1_ref[pl.ds(d, 1), :].astype(jnp.float32)
        h = jnp.maximum(acc_ref[...] + b1, 0.0)                  # (B, h) f32, ReLU

        # effective bias 2 seeds the layer-2 accumulator, then d_aug accumulating dots
        # against the resident stacked weights (same augmented-matmul trick, no concat).
        y = jnp.zeros((1, o_ref.shape[1]), jnp.float32)
        for d in range(d_aug):
            y = y + theta_ref[d] * b2_ref[pl.ds(d, 1), :].astype(jnp.float32)
        for d in range(d_aug):
            hs = (theta_ref[d] * h).astype(w2_ref.dtype)         # (B, h) bf16
            y = y + jnp.dot(hs, w2_ref[pl.ds(d * hid, hid), :],
                            preferred_element_type=jnp.float32)
        o_ref[...] = y.astype(o_ref.dtype)


def init_subspace_sequential(key, layer_sizes, dint, proj_scale=0.05,
                             param_dtype=jnp.bfloat16):
    """Frozen (W0, b0, P_w, P_b) per Linear, stored in bf16 (MXU-native, halves HBM bytes).

    Layout: W is (in_features, out_features) (transpose of PyTorch), so y = x @ W + b.
    """
    layers = []
    for in_f, out_f in zip(layer_sizes[:-1], layer_sizes[1:]):
        key, k1, k2, k3, k4 = jax.random.split(key, 5)
        w0 = jax.random.normal(k1, (in_f, out_f), jnp.float32) / jnp.sqrt(float(in_f))
        b0 = jax.random.normal(k2, (1, out_f), jnp.float32) * 0.01
        pw = jax.random.normal(k3, (dint, in_f, out_f), jnp.float32) * proj_scale
        pb = jax.random.normal(k4, (dint, 1, out_f), jnp.float32) * proj_scale
        layers.append(tuple(a.astype(param_dtype) for a in (w0, b0, pw, pb)))
    return layers


def pack_fused_params(layers, dint, *, kblk=3, lane=128):
    """Pre-stack the frozen params into the layouts the fused kernel streams/keeps resident."""
    assert len(layers) == 2, "fused kernel covers Flatten -> Linear -> ReLU -> Linear"
    (w0_1, b0_1, pw_1, pb_1), (w0_2, b0_2, pw_2, pb_2) = layers
    d_aug = dint + 1
    d_pad = _round_up(d_aug, kblk)
    in_f, hid = w0_1.shape
    hid2, out_f = w0_2.shape
    assert hid2 == hid
    out_pad = _round_up(out_f, lane)

    # layer 1: [W0_1; Pw1] stacked along the contraction dim, zero-padded to d_pad basis mats,
    # pre-flattened to 2-D so each grid step DMAs one contiguous (kblk*in_f, hid) tile.
    w1_stack = jnp.concatenate([w0_1[None], pw_1], axis=0)                 # (d_aug, in_f, hid)
    w1_stack = jnp.pad(w1_stack, ((0, d_pad - d_aug), (0, 0), (0, 0)))
    w1_stack = w1_stack.reshape(d_pad * in_f, hid)                         # (d_pad*in_f, hid)
    b1_stack = jnp.concatenate([b0_1, pb_1.reshape(dint, hid)], axis=0)    # (d_aug, hid)

    # layer 2: stacked + flattened; output lane-padded to a multiple of 128 (unmasked stores).
    w2_stack = jnp.concatenate([w0_2[None], pw_2], axis=0)                 # (d_aug, hid, out_f)
    w2_stack = jnp.pad(w2_stack, ((0, 0), (0, 0), (0, out_pad - out_f)))
    w2_stack = w2_stack.reshape(d_aug * hid, out_pad)                      # (d_aug*hid, out_pad)
    b2_stack = jnp.concatenate([b0_2, pb_2.reshape(dint, out_f)], axis=0)  # (d_aug, out_f)
    b2_stack = jnp.pad(b2_stack, ((0, 0), (0, out_pad - out_f)))

    return dict(w1_stack=w1_stack, b1_stack=b1_stack,
                w2_stack=w2_stack, b2_stack=b2_stack,
                dint=dint, d_aug=d_aug, d_pad=d_pad, kblk=kblk,
                in_f=in_f, hidden=hid, out_f=out_f, out_pad=out_pad)


def sequential_subspace_forward(x, theta, fused):
    """Forward of SequentialSubspaceWrapper: Flatten -> SubspaceLinear -> ReLU -> SubspaceLinear."""
    B = x.shape[0]
    h = x.reshape(B, -1)                                   # nn.Flatten (plain JAX glue)
    in_f, hid = fused["in_f"], fused["hidden"]
    out_f, out_pad = fused["out_f"], fused["out_pad"]
    d_aug, d_pad, kblk = fused["d_aug"], fused["d_pad"], fused["kblk"]
    assert h.shape[1] == in_f
    num_k = d_pad // kblk

    # theta_aug = [1, theta, 0-pad]; the leading 1 selects the frozen W0/b0 term.
    theta_aug = jnp.concatenate([
        jnp.ones((1,), jnp.float32),
        theta.astype(jnp.float32),
        jnp.zeros((d_pad - d_aug,), jnp.float32),
    ])

    w1, b1 = fused["w1_stack"], fused["b1_stack"]
    w2, b2 = fused["w2_stack"], fused["b2_stack"]

    flops = 2 * B * d_pad * in_f * hid + 2 * B * d_aug * hid * out_pad
    bytes_accessed = (sum(int(a.size) * a.dtype.itemsize for a in (h, w1, b1, w2, b2))
                      + B * out_pad * 4)

    out = pl.pallas_call(
        functools.partial(_fused_subspace_mlp_kernel, kblk=kblk, d_aug=d_aug),
        out_shape=jax.ShapeDtypeStruct((B, out_pad), x.dtype),
        grid_spec=pltpu.PrefetchScalarGridSpec(
            num_scalar_prefetch=1,                         # theta_aug -> SMEM
            grid=(num_k,),                                 # K-tiles of the augmented contraction
            in_specs=[
                pl.BlockSpec((B, in_f), lambda k, th: (0, 0)),                # x (resident)
                pl.BlockSpec((kblk * in_f, hid), lambda k, th: (k, 0)),       # W1 tile (pipelined)
                pl.BlockSpec((d_aug, hid), lambda k, th: (0, 0)),             # b1 (resident)
                pl.BlockSpec((d_aug * hid, out_pad), lambda k, th: (0, 0)),   # W2 (resident)
                pl.BlockSpec((d_aug, out_pad), lambda k, th: (0, 0)),         # b2 (resident)
            ],
            out_specs=pl.BlockSpec((B, out_pad), lambda k, th: (0, 0)),
            scratch_shapes=[pltpu.VMEM((B, hid), jnp.float32)],
        ),
        compiler_params=pltpu.CompilerParams(
            dimension_semantics=("arbitrary",),            # single (reduction) grid axis
        ),
        cost_estimate=pl.CostEstimate(flops=flops, transcendentals=0,
                                      bytes_accessed=bytes_accessed),
    )(theta_aug, h, w1, b1, w2, b2)

    return out[:, :out_f]                                  # drop the lane padding


def reference_forward(x, theta, layers):
    """Pure-JAX reference mirroring the PyTorch semantics (f32 math on the same stored params)."""
    h = x.reshape(x.shape[0], -1)
    n = len(layers)
    hp = jax.lax.Precision.HIGHEST
    th = theta.astype(jnp.float32)
    for i, (w0, b0, pw, pb) in enumerate(layers):
        w = w0.astype(jnp.float32) + jnp.einsum(
            'd,dio->io', th, pw.astype(jnp.float32), precision=hp)
        b = b0.astype(jnp.float32) + jnp.einsum(
            'd,dko->ko', th, pb.astype(jnp.float32), precision=hp)
        h = jnp.dot(h, w, precision=hp) + b
        if i < n - 1:
            h = jnp.maximum(h, 0.0)
    return h


if __name__ == "__main__":
    key = jax.random.PRNGKey(0)
    dint = 8
    B, C, H, W = 2, 4, 16, 16
    layer_sizes = [C * H * W, 128, 64]      # Linear(1024,128) -> ReLU -> Linear(128,64)

    kx, kt, kp = jax.random.split(key, 3)
    x = jax.random.normal(kx, (B, C, H, W), jnp.float32)
    # NOTE: the module's reset_parameters() zero-inits theta; use a nonzero deterministic theta
    # so the subspace-projection path is actually exercised.
    theta = jax.random.normal(kt, (dint,), jnp.float32) * 0.1

    layers = init_subspace_sequential(kp, layer_sizes, dint)     # frozen params (bf16)
    fused = pack_fused_params(layers, dint, kblk=3)

    out = jax.block_until_ready(sequential_subspace_forward(x, theta, fused))
    ref = reference_forward(x, theta, layers)

    assert out.shape == (B, layer_sizes[-1]), out.shape
    max_err = float(jnp.max(jnp.abs(out - ref)))
    # Kernel feeds bf16 operands to the MXU (f32 accumulation); reference uses f32 math on the
    # identical bf16-stored params, so the only delta is activation rounding + accumulation order.
    assert max_err < 2e-2, f"mismatch vs reference, max abs err = {max_err}"
    print("KERNEL_OK")
</pallas_src>

<mosaic_0001>
module attributes {stable_mosaic.version = 11 : i64} {
  func.func @_fused_subspace_mlp_kernel(%arg0: i32, %arg1: memref<9xf32, #tpu.memory_space<smem>>, %arg2: memref<2x1024xf32, #tpu.memory_space<vmem>>, %arg3: memref<3072x128xbf16, #tpu.memory_space<vmem>>, %arg4: memref<9x128xbf16, #tpu.memory_space<vmem>>, %arg5: memref<1152x128xbf16, #tpu.memory_space<vmem>>, %arg6: memref<9x128xbf16, #tpu.memory_space<vmem>>, %arg7: memref<2x128xf32, #tpu.memory_space<vmem>>, %arg8: memref<2x128xf32, #tpu.memory_space<vmem>>) attributes {dimension_semantics = [#tpu.dimension_semantics<arbitrary>], iteration_bounds = array<i64: 3>, scalar_prefetch = 1 : i64, scratch_operands = 1 : i64, tpu.core_type = #tpu.core_type<tc>, window_params = [{pipeline_mode = #tpu.pipeline_mode<synchronous>, transform_indices = @transform_0, window_bounds = array<i64: 2, 1024>}, {transform_indices = @transform_1, window_bounds = array<i64: 3072, 128>}, {pipeline_mode = #tpu.pipeline_mode<synchronous>, transform_indices = @transform_2, window_bounds = array<i64: 9, 128>}, {pipeline_mode = #tpu.pipeline_mode<synchronous>, transform_indices = @transform_3, window_bounds = array<i64: 1152, 128>}, {pipeline_mode = #tpu.pipeline_mode<synchronous>, transform_indices = @transform_4, window_bounds = array<i64: 9, 128>}, {pipeline_mode = #tpu.pipeline_mode<synchronous>, transform_indices = @transform_5, window_bounds = array<i64: 2, 128>}]} {
    %c0_i32 = arith.constant 0 : i32
    %0 = arith.cmpi eq, %arg0, %c0_i32 : i32
    %1 = arith.extui %0 : i1 to i32
    %c0_i32_0 = arith.constant 0 : i32
    %2 = arith.cmpi ne, %1, %c0_i32_0 : i32
    scf.if %2 {
      %cst_17 = arith.constant 0.000000e+00 : f32
      %39 = vector.broadcast %cst_17 : f32 to vector<2x128xf32>
      %c0_18 = arith.constant 0 : index
      %c0_19 = arith.constant 0 : index
      %40 = vector.load %arg8[%c0_18, %c0_19] : memref<2x128xf32, #tpu.memory_space<vmem>>, vector<2x128xf32>
      tpu.vector_store %arg8[%c0_18, %c0_19], %39 {strides = array<i32>} : memref<2x128xf32, #tpu.memory_space<vmem>>, vector<2x128xf32>,
    } else {
    }
    %c0 = arith.constant 0 : index
    %c0_1 = arith.constant 0 : index
    %3 = vector.load %arg2[%c0, %c0_1] : memref<2x1024xf32, #tpu.memory_space<vmem>>, vector<2x1024xf32>
    %c0_2 = arith.constant 0 : index
    %c0_3 = arith.constant 0 : index
    %4 = vector.load %arg8[%c0_2, %c0_3] : memref<2x128xf32, #tpu.memory_space<vmem>>, vector<2x128xf32>
    %c3_i32 = arith.constant 3 : i32
    %5 = arith.muli %arg0, %c3_i32 : i32
    %c0_i32_4 = arith.constant 0 : i32
    %6 = arith.addi %5, %c0_i32_4 : i32
    %7 = arith.index_cast %6 : i32 to index
    %8 = memref.load %arg1[%7] : memref<9xf32, #tpu.memory_space<smem>>
    %9 = vector.broadcast %8 : f32 to vector<2x1024xf32>
    %10 = arith.mulf %9, %3 : vector<2x1024xf32>
    %11 = arith.truncf %10 : vector<2x1024xf32> to vector<2x1024xbf16>
    %c0_5 = arith.constant 0 : index
    %c0_6 = arith.constant 0 : index
    %12 = vector.load %arg3[%c0_5, %c0_6] : memref<3072x128xbf16, #tpu.memory_space<vmem>>, vector<1024x128xbf16>
    %cst = arith.constant dense<0.000000e+00> : vector<2x128xf32>
    %13 = tpu.matmul %11, %12, %cst {dimension_numbers = #tpu.dot_dimension_numbers<[1], [0], [0], [1], [0, 0, 1, 1], [], []>} : vector<2x1024xbf16>, vector<1024x128xbf16>, vector<2x128xf32> -> vector<2x128xf32>
    %14 = arith.addf %4, %13 : vector<2x128xf32>
    %c3_i32_7 = arith.constant 3 : i32
    %15 = arith.muli %arg0, %c3_i32_7 : i32
    %c1_i32 = arith.constant 1 : i32
    %16 = arith.addi %15, %c1_i32 : i32
    %17 = arith.index_cast %16 : i32 to index
    %18 = memref.load %arg1[%17] : memref<9xf32, #tpu.memory_space<smem>>
    %19 = vector.broadcast %18 : f32 to vector<2x1024xf32>
    %20 = arith.mulf %19, %3 : vector<2x1024xf32>
    %21 = arith.truncf %20 : vector<2x1024xf32> to vector<2x1024xbf16>
    %c1024 = arith.constant 1024 : index
    %c0_8 = arith.constant 0 : index
    %22 = vector.load %arg3[%c1024, %c0_8] : memref<3072x128xbf16, #tpu.memory_space<vmem>>, vector<1024x128xbf16>
    %cst_9 = arith.constant dense<0.000000e+00> : vector<2x128xf32>
    %23 = tpu.matmul %21, %22, %cst_9 {dimension_numbers = #tpu.dot_dimension_numbers<[1], [0], [0], [1], [0, 0, 1, 1], [], []>} : vector<2x1024xbf16>, vector<1024x128xbf16>, vector<2x128xf32> -> vector<2x128xf32>
    %24 = arith.addf %14, %23 : vector<2x128xf32>
    %c3_i32_10 = arith.constant 3 : i32
    %25 = arith.muli %arg0, %c3_i32_10 : i32
    %c2_i32 = arith.constant 2 : i32
    %26 = arith.addi %25, %c2_i32 : i32
    %27 = arith.index_cast %26 : i32 to index
    %28 = memref.load %arg1[%27] : memref<9xf32, #tpu.memory_space<smem>>
    %29 = vector.broadcast %28 : f32 to vector<2x1024xf32>
    %30 = arith.mulf %29, %3 : vector<2x1024xf32>
    %31 = arith.truncf %30 : vector<2x1024xf32> to vector<2x1024xbf16>
    %c2048 = arith.constant 2048 : index
    %c0_11 = arith.constant 0 : index
    %32 = vector.load %arg3[%c2048, %c0_11] : memref<3072x128xbf16, #tpu.memory_space<vmem>>, vector<1024x128xbf16>
    %cst_12 = arith.constant dense<0.000000e+00> : vector<2x128xf32>
    %33 = tpu.matmul %31, %32, %cst_12 {dimension_numbers = #tpu.dot_dimension_numbers<[1], [0], [0], [1], [0, 0, 1, 1], [], []>} : vector<2x1024xbf16>, vector<1024x128xbf16>, vector<2x128xf32> -> vector<2x128xf32>
    %34 = arith.addf %24, %33 : vector<2x128xf32>
    %c0_13 = arith.constant 0 : index
    %c0_14 = arith.constant 0 : index
    %35 = vector.load %arg8[%c0_13, %c0_14] : memref<2x128xf32, #tpu.memory_space<vmem>>, vector<2x128xf32>
    tpu.vector_store %arg8[%c0_13, %c0_14], %34 {strides = array<i32>} : memref<2x128xf32, #tpu.memory_space<vmem>>, vector<2x128xf32>,
    %c2_i32_15 = arith.constant 2 : i32
    %36 = arith.cmpi eq, %arg0, %c2_i32_15 : i32
    %37 = arith.extui %36 : i1 to i32
    %c0_i32_16 = arith.constant 0 : i32
    %38 = arith.cmpi ne, %37, %c0_i32_16 : i32
    scf.if %38 {
      %cst_17 = arith.constant 0.000000e+00 : f32
      %39 = vector.broadcast %cst_17 : f32 to vector<1x128xf32>
      %c0_18 = arith.constant 0 : index
      %40 = memref.load %arg1[%c0_18] : memref<9xf32, #tpu.memory_space<smem>>
      %c0_19 = arith.constant 0 : index
      %c0_20 = arith.constant 0 : index
      %41 = vector.load %arg4[%c0_19, %c0_20] : memref<9x128xbf16, #tpu.memory_space<vmem>>, vector<1x128xbf16>
      %42 = arith.extf %41 : vector<1x128xbf16> to vector<1x128xf32>
      %43 = vector.broadcast %40 : f32 to vector<1x128xf32>
      %44 = arith.mulf %43, %42 : vector<1x128xf32>
      %45 = arith.addf %39, %44 : vector<1x128xf32>
      %c1 = arith.constant 1 : index
      %46 = memref.load %arg1[%c1] : memref<9xf32, #tpu.memory_space<smem>>
      %c1_21 = arith.constant 1 : index
      %c0_22 = arith.constant 0 : index
      %47 = vector.load %arg4[%c1_21, %c0_22] : memref<9x128xbf16, #tpu.memory_space<vmem>>, vector<1x128xbf16>
      %48 = arith.extf %47 : vector<1x128xbf16> to vector<1x128xf32>
      %49 = vector.broadcast %46 : f32 to vector<1x128xf32>
      %50 = arith.mulf %49, %48 : vector<1x128xf32>
      %51 = arith.addf %45, %50 : vector<1x128xf32>
      %c2 = arith.constant 2 : index
      %52 = memref.load %arg1[%c2] : memref<9xf32, #tpu.memory_space<smem>>
      %c2_23 = arith.constant 2 : index
      %c0_24 = arith.constant 0 : index
      %53 = vector.load %arg4[%c2_23, %c0_24] : memref<9x128xbf16, #tpu.memory_space<vmem>>, vector<1x128xbf16>
      %54 = arith.extf %53 : vector<1x128xbf16> to vector<1x128xf32>
      %55 = vector.broadcast %52 : f32 to vector<1x128xf32>
      %56 = arith.mulf %55, %54 : vector<1x128xf32>
      %57 = arith.addf %51, %56 : vector<1x128xf32>
      %c3 = arith.constant 3 : index
      %58 = memref.load %arg1[%c3] : memref<9xf32, #tpu.memory_space<smem>>
      %c3_25 = arith.constant 3 : index
      %c0_26 = arith.constant 0 : index
      %59 = vector.load %arg4[%c3_25, %c0_26] : memref<9x128xbf16, #tpu.memory_space<vmem>>, vector<1x128xbf16>
      %60 = arith.extf %59 : vector<1x128xbf16> to vector<1x128xf32>
      %61 = vector.broadcast %58 : f32 to vector<1x128xf32>
      %62 = arith.mulf %61, %60 : vector<1x128xf32>
      %63 = arith.addf %57, %62 : vector<1x128xf32>
      %c4 = arith.constant 4 : index
      %64 = memref.load %arg1[%c4] : memref<9xf32, #tpu.memory_space<smem>>
      %c4_27 = arith.constant 4 : index
      %c0_28 = arith.constant 0 : index
      %65 = vector.load %arg4[%c4_27, %c0_28] : memref<9x128xbf16, #tpu.memory_space<vmem>>, vector<1x128xbf16>
      %66 = arith.extf %65 : vector<1x128xbf16> to vector<1x128xf32>
      %67 = vector.broadcast %64 : f32 to vector<1x128xf32>
      %68 = arith.mulf %67, %66 : vector<1x128xf32>
      %69 = arith.addf %63, %68 : vector<1x128xf32>
      %c5 = arith.constant 5 : index
      %70 = memref.load %arg1[%c5] : memref<9xf32, #tpu.memory_space<smem>>
      %c5_29 = arith.constant 5 : index
      %c0_30 = arith.constant 0 : index
      %71 = vector.load %arg4[%c5_29, %c0_30] : memref<9x128xbf16, #tpu.memory_space<vmem>>, vector<1x128xbf16>
      %72 = arith.extf %71 : vector<1x128xbf16> to vector<1x128xf32>
      %73 = vector.broadcast %70 : f32 to vector<1x128xf32>
      %74 = arith.mulf %73, %72 : vector<1x128xf32>
      %75 = arith.addf %69, %74 : vector<1x128xf32>
      %c6 = arith.constant 6 : index
      %76 = memref.load %arg1[%c6] : memref<9xf32, #tpu.memory_space<smem>>
      %c6_31 = arith.constant 6 : index
      %c0_32 = arith.constant 0 : index
      %77 = vector.load %arg4[%c6_31, %c0_32] : memref<9x128xbf16, #tpu.memory_space<vmem>>, vector<1x128xbf16>
      %78 = arith.extf %77 : vector<1x128xbf16> to vector<1x128xf32>
      %79 = vector.broadcast %76 : f32 to vector<1x128xf32>
      %80 = arith.mulf %79, %78 : vector<1x128xf32>
      %81 = arith.addf %75, %80 : vector<1x128xf32>
      %c7 = arith.constant 7 : index
      %82 = memref.load %arg1[%c7] : memref<9xf32, #tpu.memory_space<smem>>
      %c7_33 = arith.constant 7 : index
      %c0_34 = arith.constant 0 : index
      %83 = vector.load %arg4[%c7_33, %c0_34] : memref<9x128xbf16, #tpu.memory_space<vmem>>, vector<1x128xbf16>
      %84 = arith.extf %83 : vector<1x128xbf16> to vector<1x128xf32>
      %85 = vector.broadcast %82 : f32 to vector<1x128xf32>
      %86 = arith.mulf %85, %84 : vector<1x128xf32>
      %87 = arith.addf %81, %86 : vector<1x128xf32>
      %c8 = arith.constant 8 : index
      %88 = memref.load %arg1[%c8] : memref<9xf32, #tpu.memory_space<smem>>
      %c8_35 = arith.constant 8 : index
      %c0_36 = arith.constant 0 : index
      %89 = vector.load %arg4[%c8_35, %c0_36] : memref<9x128xbf16, #tpu.memory_space<vmem>>, vector<1x128xbf16>
      %90 = arith.extf %89 : vector<1x128xbf16> to vector<1x128xf32>
      %91 = vector.broadcast %88 : f32 to vector<1x128xf32>
      %92 = arith.mulf %91, %90 : vector<1x128xf32>
      %93 = arith.addf %87, %92 : vector<1x128xf32>
      %c0_37 = arith.constant 0 : index
      %c0_38 = arith.constant 0 : index
      %94 = vector.load %arg8[%c0_37, %c0_38] : memref<2x128xf32, #tpu.memory_space<vmem>>, vector<2x128xf32>
      %95 = vector.broadcast %93 : vector<1x128xf32> to vector<2x128xf32>
      %96 = arith.addf %94, %95 : vector<2x128xf32>
      %cst_39 = arith.constant 0.000000e+00 : f32
      %97 = vector.broadcast %cst_39 : f32 to vector<2x128xf32>
      %98 = arith.maximumf %96, %97 : vector<2x128xf32>
      %cst_40 = arith.constant 0.000000e+00 : f32
      %99 = vector.broadcast %cst_40 : f32 to vector<1x128xf32>
      %c0_41 = arith.constant 0 : index
      %100 = memref.load %arg1[%c0_41] : memref<9xf32, #tpu.memory_space<smem>>
      %c0_42 = arith.constant 0 : index
      %c0_43 = arith.constant 0 : index
      %101 = vector.load %arg6[%c0_42, %c0_43] : memref<9x128xbf16, #tpu.memory_space<vmem>>, vector<1x128xbf16>
      %102 = arith.extf %101 : vector<1x128xbf16> to vector<1x128xf32>
      %103 = vector.broadcast %100 : f32 to vector<1x128xf32>
      %104 = arith.mulf %103, %102 : vector<1x128xf32>
      %105 = arith.addf %99, %104 : vector<1x128xf32>
      %c1_44 = arith.constant 1 : index
      %106 = memref.load %arg1[%c1_44] : memref<9xf32, #tpu.memory_space<smem>>
      %c1_45 = arith.constant 1 : index
      %c0_46 = arith.constant 0 : index
      %107 = vector.load %arg6[%c1_45, %c0_46] : memref<9x128xbf16, #tpu.memory_space<vmem>>, vector<1x128xbf16>
      %108 = arith.extf %107 : vector<1x128xbf16> to vector<1x128xf32>
      %109 = vector.broadcast %106 : f32 to vector<1x128xf32>
      %110 = arith.mulf %109, %108 : vector<1x128xf32>
      %111 = arith.addf %105, %110 : vector<1x128xf32>
      %c2_47 = arith.constant 2 : index
      %112 = memref.load %arg1[%c2_47] : memref<9xf32, #tpu.memory_space<smem>>
      %c2_48 = arith.constant 2 : index
      %c0_49 = arith.constant 0 : index
      %113 = vector.load %arg6[%c2_48, %c0_49] : memref<9x128xbf16, #tpu.memory_space<vmem>>, vector<1x128xbf16>
      %114 = arith.extf %113 : vector<1x128xbf16> to vector<1x128xf32>
      %115 = vector.broadcast %112 : f32 to vector<1x128xf32>
      %116 = arith.mulf %115, %114 : vector<1x128xf32>
      %117 = arith.addf %111, %116 : vector<1x128xf32>
      %c3_50 = arith.constant 3 : index
      %118 = memref.load %arg1[%c3_50] : memref<9xf32, #tpu.memory_space<smem>>
      %c3_51 = arith.constant 3 : index
      %c0_52 = arith.constant 0 : index
      %119 = vector.load %arg6[%c3_51, %c0_52] : memref<9x128xbf16, #tpu.memory_space<vmem>>, vector<1x128xbf16>
      %120 = arith.extf %119 : vector<1x128xbf16> to vector<1x128xf32>
      %121 = vector.broadcast %118 : f32 to vector<1x128xf32>
      %122 = arith.mulf %121, %120 : vector<1x128xf32>
      %123 = arith.addf %117, %122 : vector<1x128xf32>
      %c4_53 = arith.constant 4 : index
      %124 = memref.load %arg1[%c4_53] : memref<9xf32, #tpu.memory_space<smem>>
      %c4_54 = arith.constant 4 : index
      %c0_55 = arith.constant 0 : index
      %125 = vector.load %arg6[%c4_54, %c0_55] : memref<9x128xbf16, #tpu.memory_space<vmem>>, vector<1x128xbf16>
      %126 = arith.extf %125 : vector<1x128xbf16> to vector<1x128xf32>
      %127 = vector.broadcast %124 : f32 to vector<1x128xf32>
      %128 = arith.mulf %127, %126 : vector<1x128xf32>
      %129 = arith.addf %123, %128 : vector<1x128xf32>
      %c5_56 = arith.constant 5 : index
      %130 = memref.load %arg1[%c5_56] : memref<9xf32, #tpu.memory_space<smem>>
      %c5_57 = arith.constant 5 : index
      %c0_58 = arith.constant 0 : index
      %131 = vector.load %arg6[%c5_57, %c0_58] : memref<9x128xbf16, #tpu.memory_space<vmem>>, vector<1x128xbf16>
      %132 = arith.extf %131 : vector<1x128xbf16> to vector<1x128xf32>
      %133 = vector.broadcast %130 : f32 to vector<1x128xf32>
      %134 = arith.mulf %133, %132 : vector<1x128xf32>
      %135 = arith.addf %129, %134 : vector<1x128xf32>
      %c6_59 = arith.constant 6 : index
      %136 = memref.load %arg1[%c6_59] : memref<9xf32, #tpu.memory_space<smem>>
      %c6_60 = arith.constant 6 : index
      %c0_61 = arith.constant 0 : index
      %137 = vector.load %arg6[%c6_60, %c0_61] : memref<9x128xbf16, #tpu.memory_space<vmem>>, vector<1x128xbf16>
      %138 = arith.extf %137 : vector<1x128xbf16> to vector<1x128xf32>
      %139 = vector.broadcast %136 : f32 to vector<1x128xf32>
      %140 = arith.mulf %139, %138 : vector<1x128xf32>
      %141 = arith.addf %135, %140 : vector<1x128xf32>
      %c7_62 = arith.constant 7 : index
      %142 = memref.load %arg1[%c7_62] : memref<9xf32, #tpu.memory_space<smem>>
      %c7_63 = arith.constant 7 : index
      %c0_64 = arith.constant 0 : index
      %143 = vector.load %arg6[%c7_63, %c0_64] : memref<9x128xbf16, #tpu.memory_space<vmem>>, vector<1x128xbf16>
      %144 = arith.extf %143 : vector<1x128xbf16> to vector<1x128xf32>
      %145 = vector.broadcast %142 : f32 to vector<1x128xf32>
      %146 = arith.mulf %145, %144 : vector<1x128xf32>
      %147 = arith.addf %141, %146 : vector<1x128xf32>
      %c8_65 = arith.constant 8 : index
      %148 = memref.load %arg1[%c8_65] : memref<9xf32, #tpu.memory_space<smem>>
      %c8_66 = arith.constant 8 : index
      %c0_67 = arith.constant 0 : index
      %149 = vector.load %arg6[%c8_66, %c0_67] : memref<9x128xbf16, #tpu.memory_space<vmem>>, vector<1x128xbf16>
      %150 = arith.extf %149 : vector<1x128xbf16> to vector<1x128xf32>
      %151 = vector.broadcast %148 : f32 to vector<1x128xf32>
      %152 = arith.mulf %151, %150 : vector<1x128xf32>
      %153 = arith.addf %147, %152 : vector<1x128xf32>
      %c0_68 = arith.constant 0 : index
      %154 = memref.load %arg1[%c0_68] : memref<9xf32, #tpu.memory_space<smem>>
      %155 = vector.broadcast %154 : f32 to vector<2x128xf32>
      %156 = arith.mulf %155, %98 : vector<2x128xf32>
      %157 = arith.truncf %156 : vector<2x128xf32> to vector<2x128xbf16>
      %c0_69 = arith.constant 0 : index
      %c0_70 = arith.constant 0 : index
      %158 = vector.load %arg5[%c0_69, %c0_70] : memref<1152x128xbf16, #tpu.memory_space<vmem>>, vector<128x128xbf16>
      %cst_71 = arith.constant dense<0.000000e+00> : vector<2x128xf32>
      %159 = tpu.matmul %157, %158, %cst_71 {dimension_numbers = #tpu.dot_dimension_numbers<[1], [0], [0], [1], [0, 0, 1, 1], [], []>} : vector<2x128xbf16>, vector<128x128xbf16>, vector<2x128xf32> -> vector<2x128xf32>
      %160 = vector.broadcast %153 : vector<1x128xf32> to vector<2x128xf32>
      %161 = arith.addf %160, %159 : vector<2x128xf32>
      %c1_72 = arith.constant 1 : index
      %162 = memref.load %arg1[%c1_72] : memref<9xf32, #tpu.memory_space<smem>>
      %163 = vector.broadcast %162 : f32 to vector<2x128xf32>
      %164 = arith.mulf %163, %98 : vector<2x128xf32>
      %165 = arith.truncf %164 : vector<2x128xf32> to vector<2x128xbf16>
      %c128 = arith.constant 128 : index
      %c0_73 = arith.constant 0 : index
      %166 = vector.load %arg5[%c128, %c0_73] : memref<1152x128xbf16, #tpu.memory_space<vmem>>, vector<128x128xbf16>
      %cst_74 = arith.constant dense<0.000000e+00> : vector<2x128xf32>
      %167 = tpu.matmul %165, %166, %cst_74 {dimension_numbers = #tpu.dot_dimension_numbers<[1], [0], [0], [1], [0, 0, 1, 1], [], []>} : vector<2x128xbf16>, vector<128x128xbf16>, vector<2x128xf32> -> vector<2x128xf32>
      %168 = arith.addf %161, %167 : vector<2x128xf32>
      %c2_75 = arith.constant 2 : index
      %169 = memref.load %arg1[%c2_75] : memref<9xf32, #tpu.memory_space<smem>>
      %170 = vector.broadcast %169 : f32 to vector<2x128xf32>
      %171 = arith.mulf %170, %98 : vector<2x128xf32>
      %172 = arith.truncf %171 : vector<2x128xf32> to vector<2x128xbf16>
      %c256 = arith.constant 256 : index
      %c0_76 = arith.constant 0 : index
      %173 = vector.load %arg5[%c256, %c0_76] : memref<1152x128xbf16, #tpu.memory_space<vmem>>, vector<128x128xbf16>
      %cst_77 = arith.constant dense<0.000000e+00> : vector<2x128xf32>
      %174 = tpu.matmul %172, %173, %cst_77 {dimension_numbers = #tpu.dot_dimension_numbers<[1], [0], [0], [1], [0, 0, 1, 1], [], []>} : vector<2x128xbf16>, vector<128x128xbf16>, vector<2x128xf32> -> vector<2x128xf32>
      %175 = arith.addf %168, %174 : vector<2x128xf32>
      %c3_78 = arith.constant 3 : index
      %176 = memref.load %arg1[%c3_78] : memref<9xf32, #tpu.memory_space<smem>>
      %177 = vector.broadcast %176 : f32 to vector<2x128xf32>
      %178 = arith.mulf %177, %98 : vector<2x128xf32>
      %179 = arith.truncf %178 : vector<2x128xf32> to vector<2x128xbf16>
      %c384 = arith.constant 384 : index
      %c0_79 = arith.constant 0 : index
      %180 = vector.load %arg5[%c384, %c0_79] : memref<1152x128xbf16, #tpu.memory_space<vmem>>, vector<128x128xbf16>
      %cst_80 = arith.constant dense<0.000000e+00> : vector<2x128xf32>
      %181 = tpu.matmul %179, %180, %cst_80 {dimension_numbers = #tpu.dot_dimension_numbers<[1], [0], [0], [1], [0, 0, 1, 1], [], []>} : vector<2x128xbf16>, vector<128x128xbf16>, vector<2x128xf32> -> vector<2x128xf32>
      %182 = arith.addf %175, %181 : vector<2x128xf32>
      %c4_81 = arith.constant 4 : index
      %183 = memref.load %arg1[%c4_81] : memref<9xf32, #tpu.memory_space<smem>>
      %184 = vector.broadcast %183 : f32 to vector<2x128xf32>
      %185 = arith.mulf %184, %98 : vector<2x128xf32>
      %186 = arith.truncf %185 : vector<2x128xf32> to vector<2x128xbf16>
      %c512 = arith.constant 512 : index
      %c0_82 = arith.constant 0 : index
      %187 = vector.load %arg5[%c512, %c0_82] : memref<1152x128xbf16, #tpu.memory_space<vmem>>, vector<128x128xbf16>
      %cst_83 = arith.constant dense<0.000000e+00> : vector<2x128xf32>
      %188 = tpu.matmul %186, %187, %cst_83 {dimension_numbers = #tpu.dot_dimension_numbers<[1], [0], [0], [1], [0, 0, 1, 1], [], []>} : vector<2x128xbf16>, vector<128x128xbf16>, vector<2x128xf32> -> vector<2x128xf32>
      %189 = arith.addf %182, %188 : vector<2x128xf32>
      %c5_84 = arith.constant 5 : index
      %190 = memref.load %arg1[%c5_84] : memref<9xf32, #tpu.memory_space<smem>>
      %191 = vector.broadcast %190 : f32 to vector<2x128xf32>
      %192 = arith.mulf %191, %98 : vector<2x128xf32>
      %193 = arith.truncf %192 : vector<2x128xf32> to vector<2x128xbf16>
      %c640 = arith.constant 640 : index
      %c0_85 = arith.constant 0 : index
      %194 = vector.load %arg5[%c640, %c0_85] : memref<1152x128xbf16, #tpu.memory_space<vmem>>, vector<128x128xbf16>
      %cst_86 = arith.constant dense<0.000000e+00> : vector<2x128xf32>
      %195 = tpu.matmul %193, %194, %cst_86 {dimension_numbers = #tpu.dot_dimension_numbers<[1], [0], [0], [1], [0, 0, 1, 1], [], []>} : vector<2x128xbf16>, vector<128x128xbf16>, vector<2x128xf32> -> vector<2x128xf32>
      %196 = arith.addf %189, %195 : vector<2x128xf32>
      %c6_87 = arith.constant 6 : index
      %197 = memref.load %arg1[%c6_87] : memref<9xf32, #tpu.memory_space<smem>>
      %198 = vector.broadcast %197 : f32 to vector<2x128xf32>
      %199 = arith.mulf %198, %98 : vector<2x128xf32>
      %200 = arith.truncf %199 : vector<2x128xf32> to vector<2x128xbf16>
      %c768 = arith.constant 768 : index
      %c0_88 = arith.constant 0 : index
      %201 = vector.load %arg5[%c768, %c0_88] : memref<1152x128xbf16, #tpu.memory_space<vmem>>, vector<128x128xbf16>
      %cst_89 = arith.constant dense<0.000000e+00> : vector<2x128xf32>
      %202 = tpu.matmul %200, %201, %cst_89 {dimension_numbers = #tpu.dot_dimension_numbers<[1], [0], [0], [1], [0, 0, 1, 1], [], []>} : vector<2x128xbf16>, vector<128x128xbf16>, vector<2x128xf32> -> vector<2x128xf32>
      %203 = arith.addf %196, %202 : vector<2x128xf32>
      %c7_90 = arith.constant 7 : index
      %204 = memref.load %arg1[%c7_90] : memref<9xf32, #tpu.memory_space<smem>>
      %205 = vector.broadcast %204 : f32 to vector<2x128xf32>
      %206 = arith.mulf %205, %98 : vector<2x128xf32>
      %207 = arith.truncf %206 : vector<2x128xf32> to vector<2x128xbf16>
      %c896 = arith.constant 896 : index
      %c0_91 = arith.constant 0 : index
      %208 = vector.load %arg5[%c896, %c0_91] : memref<1152x128xbf16, #tpu.memory_space<vmem>>, vector<128x128xbf16>
      %cst_92 = arith.constant dense<0.000000e+00> : vector<2x128xf32>
      %209 = tpu.matmul %207, %208, %cst_92 {dimension_numbers = #tpu.dot_dimension_numbers<[1], [0], [0], [1], [0, 0, 1, 1], [], []>} : vector<2x128xbf16>, vector<128x128xbf16>, vector<2x128xf32> -> vector<2x128xf32>
      %210 = arith.addf %203, %209 : vector<2x128xf32>
      %c8_93 = arith.constant 8 : index
      %211 = memref.load %arg1[%c8_93] : memref<9xf32, #tpu.memory_space<smem>>
      %212 = vector.broadcast %211 : f32 to vector<2x128xf32>
      %213 = arith.mulf %212, %98 : vector<2x128xf32>
      %214 = arith.truncf %213 : vector<2x128xf32> to vector<2x128xbf16>
      %c1024_94 = arith.constant 1024 : index
      %c0_95 = arith.constant 0 : index
      %215 = vector.load %arg5[%c1024_94, %c0_95] : memref<1152x128xbf16, #tpu.memory_space<vmem>>, vector<128x128xbf16>
      %cst_96 = arith.constant dense<0.000000e+00> : vector<2x128xf32>
      %216 = tpu.matmul %214, %215, %cst_96 {dimension_numbers = #tpu.dot_dimension_numbers<[1], [0], [0], [1], [0, 0, 1, 1], [], []>} : vector<2x128xbf16>, vector<128x128xbf16>, vector<2x128xf32> -> vector<2x128xf32>
      %217 = arith.addf %210, %216 : vector<2x128xf32>
      %c0_97 = arith.constant 0 : index
      %c0_98 = arith.constant 0 : index
      %218 = vector.load %arg7[%c0_97, %c0_98] : memref<2x128xf32, #tpu.memory_space<vmem>>, vector<2x128xf32>
      tpu.vector_store %arg7[%c0_97, %c0_98], %217 {strides = array<i32>} : memref<2x128xf32, #tpu.memory_space<vmem>>, vector<2x128xf32>,
    } else {
    }
    return
  }
  func.func @transform_0(%arg0: i32, %arg1: memref<9xf32, #tpu.memory_space<smem>>) -> (i32, i32) {
    %c0_i32 = arith.constant 0 : i32
    %c0_i32_0 = arith.constant 0 : i32
    %c0_i32_1 = arith.constant 0 : i32
    return %c0_i32, %c0_i32_0 : i32, i32
  }
  func.func @transform_1(%arg0: i32, %arg1: memref<9xf32, #tpu.memory_space<smem>>) -> (i32, i32) {
    %c0_i32 = arith.constant 0 : i32
    %c0_i32_0 = arith.constant 0 : i32
    return %arg0, %c0_i32 : i32, i32
  }
  func.func @transform_2(%arg0: i32, %arg1: memref<9xf32, #tpu.memory_space<smem>>) -> (i32, i32) {
    %c0_i32 = arith.constant 0 : i32
    %c0_i32_0 = arith.constant 0 : i32
    %c0_i32_1 = arith.constant 0 : i32
    return %c0_i32, %c0_i32_0 : i32, i32
  }
  func.func @transform_3(%arg0: i32, %arg1: memref<9xf32, #tpu.memory_space<smem>>) -> (i32, i32) {
    %c0_i32 = arith.constant 0 : i32
    %c0_i32_0 = arith.constant 0 : i32
    %c0_i32_1 = arith.constant 0 : i32
    return %c0_i32, %c0_i32_0 : i32, i32
  }
  func.func @transform_4(%arg0: i32, %arg1: memref<9xf32, #tpu.memory_space<smem>>) -> (i32, i32) {
    %c0_i32 = arith.constant 0 : i32
    %c0_i32_0 = arith.constant 0 : i32
    %c0_i32_1 = arith.constant 0 : i32
    return %c0_i32, %c0_i32_0 : i32, i32
  }
  func.func @transform_5(%arg0: i32, %arg1: memref<9xf32, #tpu.memory_space<smem>>) -> (i32, i32) {
    %c0_i32 = arith.constant 0 : i32
    %c0_i32_0 = arith.constant 0 : i32
    %c0_i32_1 = arith.constant 0 : i32
    return %c0_i32, %c0_i32_0 : i32, i32
  }
}

</mosaic_0001>

<bundles_post_ra>
// kernel: tpu_custom_call.1
= control target key start
LH: loop header
LB: loop body
LE: loop exit
PB: predicated region body
PF: predicated region fallthrough
CT: control target
= control target key end

     0   :  { %s5915_s0 = inlined_call_operand.hbm [shape: f32[9], index: 0, kind: input, shape index: {}]   ;;  %s5916_s1 = inlined_call_operand.hbm [shape: f32[2,1024], index: 1, kind: input, shape index: {}]   ;;  %s5917_s2 = inlined_call_operand.hbm [shape: bf16[9216,128], index: 2, kind: input, shape index: {}]   ;;  %s5918_s3 = inlined_call_operand.hbm [shape: bf16[9,128], index: 3, kind: input, shape index: {}]   ;;  %s5919_s4 = inlined_call_operand.hbm [shape: bf16[1152,128], index: 4, kind: input, shape index: {}]   ;;  %s5920_s5 = inlined_call_operand.hbm [shape: bf16[9,128], index: 5, kind: input, shape index: {}]   ;;  %s5921_s6 = inlined_call_operand.hbm [shape: f32[2,128], index: 6, kind: output, shape index: {}]  }
   0x1   :  { %s4892_s23 = scalar_lea.hbm %s5915_s0, 16 }
   0x2   :  { %p4893_p0 = scmp.ne.s32.totalorder %s5915_s0, %s4892_s23  ;;  %p4896_p1 = scmp.lt.u32.totalorder %s4892_s23, %s5915_s0 }
   0x4   :  { %p4898_p2 = pnand %p4896_p1, %p4893_p0 }
   0x6   :  { %4901 = shalt.err (!%p4898_p2)  }
   0x7   :  { %s5124_s28 = smov [#allocation4]  }
   0x8   :  { %12 = dma.hbm_to_smem %s5915_s0, 16, %s5124_s28, [#allocation3] }
   0x9   :  { %5086 = dma.done.wait [#allocation3], 16 }
   0xa   :  { %5087 = vsyncadd [#allocation3], 4294967280 }
   0xb   :  { %14 = sfence }
   0xc   :  { %15 = vsyncpa [#allocation6], 0 }
   0xd   :  { %16 = vsyncpa [#allocation9], 0 }
   0xe   :  { %18 = vsyncpa [#allocation9 + $0x1], 0 }
   0xf   :  { %19 = vsyncpa [#allocation12], 0 }
  0x10   :  { %20 = vsyncpa [#allocation7], 0  ;;  %s5184_s7 = smov 0   ;;  %s5186_s8 = smov 0  }
  0x11   :  { %s5188_s9 = smov 0   ;;  %s5190_s10 = smov 0  }
  0x12 LB: > { %s5203_s0 = sadd.s32 4294967295, %s5122_s10   ;;  %p67_p3 = scmp.ne.s32.totalorder %s5114_s8, %s5110_s7  ;;  %s5122_s10 = sphi %s5190_s10, %s5942_s10   ;;  %s5118_s9 = sphi %s5188_s9, %s5941_s9   ;;  %s5114_s8 = sphi %s5186_s8, %s5940_s8   ;;  %s5110_s7 = sphi %s5184_s7, %s5939_s7  }
  0x13   : > { %p5922_p4 = scmp.eq.s32.totalorder %s5203_s0, 0  ;;  %p3686_p5 = scmp.ge.s32.totalorder %s5122_s10, 1 }
  0x14   : > { %p162_p6 = scmp.lt.s32.totalorder %s5122_s10, 4  ;;  %s5125_s13 = smov [#allocation10]  }
  0x15   : > { %p5212_p8 = por %p5922_p4, %p67_p3  ;;  %s185_s14 = sshll.u32 %s5125_s13, 4  ;;  %s5220_s14 = int_to_ptr.vmem [resolvable:$true] %s185_s14 }
  0x16   : > { %p5216_p9 = pnand %p3686_p5, %p162_p6  ;;  %s5126_s16 = smov [#allocation11]  }
  0x17   : > { %s5925_s11 = scalar_select %p5212_p8, 1, 0 }
  0x18   : > { %s5926_s12 = scalar_select %p5216_p9, 1, 0 }
  0x19   : > { %p4556_p10 = pneg %p5216_p9  ;;  %s198_s17 = sshll.u32 %s5126_s16, 4  ;;  %s5230_s17 = int_to_ptr.vmem [resolvable:$true] %s198_s17 }
  0x1a   : > { %s5127_s18 = smov [#allocation5]   ;;  %s4902_s22 = scalar_lea.hbm %s5918_s3, 128 }
  0x1b   : > { %p5226_p11 = pnand %p4556_p10, %p5922_p4  ;;  %s5232_s19 = sshll.u32 %s5127_s18, 4  ;;  %s176_s19 = int_to_ptr.vmem [resolvable:$true] %s5232_s19 }
  0x1c   : > { %p4903_p12 = scmp.ne.s32.totalorder %s5918_s3, %s4902_s22  ;;  %p4909_p2 = scmp.lt.u32.totalorder %s4902_s22, %s5918_s3 }
  0x1d   : > { %p5242_p13 = pneg %p5226_p11 }
  0x1f   : > { %p4905_p0 = pnand %p5242_p13, %p4903_p12 }
  0x21   : > { %p4906_p1 = pneg %p4905_p0 }
  0x23   : > { %p4911_p3 = pnand %p4909_p2, %p4906_p1 }
  0x25   : > { %4914 = shalt.err (!%p4911_p3)
}
  0x26   : > { %s4915_s28 = scalar_lea.vmem %s5220_s14, 128  ;;  %p4923_p7 = scmp.lt.s32.totalorder %s5220_s14, %s5220_s14 }
  0x27   : > { %p4916_p5 = scmp.ne.s32.totalorder %s5220_s14, %s4915_s28  ;;  %p4924_p4 = scmp.lt.s32.totalorder %s4915_s28, %s4915_s28 }
  0x29   : > { %p4918_p6 = pnand %p4916_p5, %p5242_p13  ;;  %p4925_p12 = por %p4924_p4, %p4923_p7 }
  0x2b   : > { %p4919_p10 = pneg %p4918_p6 }
  0x2d   : > { %p4926_p0 = pnand %p4925_p12, %p4919_p10 }
  0x2f   : > { %4929 = shalt.err (!%p4926_p0)
}
  0x30   : > { %s5128_s29 = smov 64   ;;  %s5129_s30 = smov 4  }
  0x31   : > { %4562 = dma.hbm_to_vmem [thread:$0]  (!%p5226_p11), %s5918_s3, 128, %s5220_s14, [#allocation9], %s5128_s29, %s5128_s29, %s5129_s30  }
  0x32   : > { %s4930_s20 = scalar_lea.hbm %s5919_s4, 9216 }
  0x33   : > { %p4931_p4 = scmp.ne.s32.totalorder %s5919_s4, %s4930_s20  ;;  %p4937_p2 = scmp.lt.u32.totalorder %s4930_s20, %s5919_s4 }
  0x35   : > { %p4933_p7 = pnand %p4931_p4, %p5242_p13 }
  0x37   : > { %p4934_p1 = pneg %p4933_p7 }
  0x39   : > { %p4939_p3 = pnand %p4937_p2, %p4934_p1 }
  0x3b   : > { %4942 = shalt.err (!%p4939_p3)
}
  0x3c   : > { %s4943_s14 = scalar_lea.vmem %s5230_s17, 9216  ;;  %p4951_p12 = scmp.lt.s32.totalorder %s5230_s17, %s5230_s17 }
  0x3d   : > { %p4944_p5 = scmp.ne.s32.totalorder %s5230_s17, %s4943_s14  ;;  %p4952_p0 = scmp.lt.s32.totalorder %s4943_s14, %s4943_s14 }
  0x3f   : > { %p4946_p6 = pnand %p4944_p5, %p5242_p13  ;;  %p4953_p4 = por %p4952_p0, %p4951_p12 }
  0x41   : > { %p4947_p10 = pneg %p4946_p6 }
  0x43   : > { %p4954_p7 = pnand %p4953_p4, %p4947_p10 }
  0x45   : > { %4957 = shalt.err (!%p4954_p7)
}
  0x46   : > { %4565 = dma.hbm_to_vmem [thread:$0]  (!%p5226_p11), %s5919_s4, 9216, %s5230_s17, [#allocation12], %s5128_s29, %s5128_s29, %s5129_s30  }
  0x47   : > { %s4958_s13 = scalar_lea.hbm %s5916_s1, 256 }
  0x48   : > { %p4959_p1 = scmp.ne.s32.totalorder %s5916_s1, %s4958_s13  ;;  %p4965_p5 = scmp.lt.u32.totalorder %s4958_s13, %s5916_s1 }
  0x4a   : > { %p4961_p2 = pnand %p4959_p1, %p5242_p13 }
  0x4c   : > { %p4962_p3 = pneg %p4961_p2 }
  0x4e   : > { %p4967_p6 = pnand %p4965_p5, %p4962_p3 }
  0x50   : > { %4970 = shalt.err (!%p4967_p6)
}
  0x51   : > { %s4971_s22 = scalar_lea.vmem %s176_s19, 256  ;;  %p4979_p4 = scmp.lt.s32.totalorder %s176_s19, %s176_s19 }
  0x52   : > { %p4972_p10 = scmp.ne.s32.totalorder %s176_s19, %s4971_s22  ;;  %p4980_p7 = scmp.lt.s32.totalorder %s4971_s22, %s4971_s22 }
  0x54   : > { %p4974_p12 = pnand %p4972_p10, %p5242_p13  ;;  %p4981_p8 = por %p4980_p7, %p4979_p4 }
  0x56   : > { %p4975_p0 = pneg %p4974_p12 }
  0x58   : > { %p4982_p9 = pnand %p4981_p8, %p4975_p0 }
  0x5a   : > { %4985 = shalt.err (!%p4982_p9)
}
  0x5b   : > { %4559 = dma.hbm_to_vmem [thread:$0]  (!%p5226_p11), %s5916_s1, 256, %s176_s19, [#allocation6]  }
  0x5c   : > { %s5130_s24 = smov [#allocation13]   ;;  %s4986_s28 = scalar_lea.hbm %s5920_s5, 128 }
  0x5d   : > { %s211_s14 = sshll.u32 %s5130_s24, 4  ;;  %p4987_p1 = scmp.ne.s32.totalorder %s5920_s5, %s4986_s28  ;;  %s212_s14 = int_to_ptr.vmem [resolvable:$true] %s211_s14 }
  0x5e   : > { %p4993_p2 = scmp.lt.u32.totalorder %s4986_s28, %s5920_s5 }
  0x5f   : > { %p4989_p8 = pnand %p4987_p1, %p5242_p13 }
  0x61   : > { %p4990_p9 = pneg %p4989_p8 }
  0x63   : > { %p4995_p3 = pnand %p4993_p2, %p4990_p9 }
  0x65   : > { %4998 = shalt.err (!%p4995_p3)
}
  0x66   : > { %s4999_s19 = scalar_lea.vmem %s212_s14, 128  ;;  %p5007_p12 = scmp.lt.s32.totalorder %s212_s14, %s212_s14 }
  0x67   : > { %p5000_p5 = scmp.ne.s32.totalorder %s212_s14, %s4999_s19  ;;  %p5008_p0 = scmp.lt.s32.totalorder %s4999_s19, %s4999_s19 }
  0x69   : > { %p5002_p6 = pnand %p5000_p5, %p5242_p13  ;;  %p5009_p4 = por %p5008_p0, %p5007_p12 }
  0x6b   : > { %p5003_p10 = pneg %p5002_p6 }
  0x6d   : > { %p5010_p7 = pnand %p5009_p4, %p5003_p10 }
  0x6f   : > { %5013 = shalt.err (!%p5010_p7)
}
  0x70   : > { %4568 = dma.hbm_to_vmem [thread:$0]  (!%p5226_p11), %s5920_s5, 128, %s212_s14, [#allocation12], %s5128_s29, %s5128_s29, %s5129_s30  }
  0x71   : > { %s5333_s25 = sadd.s32 1, %s5122_s10   ;;  %s54_s15 = sadd.s32 1, %s5118_s9 }
  0x72   : > { %s51_s22 = ssub.s32 %s5122_s10, %s5333_s25  ;;  %p61_p13 = scmp.ne.s32.totalorder %s5118_s9, %s5114_s8 }
  0x73   : > { %p52_p1 = scmp.eq.s32.totalorder %s51_s22, 0  ;;  %p62_p8 = scmp.eq.s32.totalorder %s5122_s10, 0 }
  0x74   : > { %p4577_p9 = scmp.lt.s32.totalorder %s5122_s10, 3  ;;  %s225_s23 = sand.u32 1, %s5122_s10  }
  0x75   : > { %s5343_s17 = scalar_select %p52_p1, %s5118_s9, %s54_s15  }
  0x76   : > { %p63_p2 = por %p62_p8, %p61_p13  ;;  %s227_s24 = sand.u32 1, %s5118_s9  }
  0x77   : > { %s3976_s26 = smul.u32 24576, %s5122_s10  ;;  %s5359_s10 = scalar_lea.sflag [#allocation9], %s225_s23 }
  0x78   : > { %s4532_s27 = smul.u32 1536, %s227_s24  ;;  %p5348_p3 = pnand %p4577_p9, %p63_p2 }
  0x79   : > { %s5355_s13 = scalar_lea.hbm %s5917_s2, %s3976_s26  ;;  %s5019_s15 = scalar_lea.hbm %s5917_s2, 73728 }
  0x7a   : > { %s229_s16 = scalar_lea.vmem [#allocation8], %s4532_s27  ;;  %s5014_s19 = scalar_lea.hbm %s5355_s13, 24576 }
  0x7b   : > { %s236_s18 = sshll.u32 %s229_s16, 4  ;;  %p5015_p11 = scmp.ne.s32.totalorder %s5355_s13, %s5014_s19  ;;  %s5357_s18 = int_to_ptr.vmem [resolvable:$true] %s236_s18 }
  0x7c   : > { %p5016_p5 = pneg %p5348_p3  ;;  %p5020_p12 = scmp.lt.u32.totalorder %s5355_s13, %s5917_s2 }
  0x7d   : > { %p5021_p0 = scmp.lt.u32.totalorder %s5019_s15, %s5014_s19  ;;  %p5023_p7 = scmp.lt.u32.totalorder %s5014_s19, %s5355_s13 }
  0x7e   : > { %p5017_p6 = pnand %p5016_p5, %p5015_p11 }
  0x7f   : > { %p5022_p4 = por %p5021_p0, %p5020_p12 }
  0x80   : > { %p5018_p10 = pneg %p5017_p6 }
  0x81   : > { %p5024_p13 = por %p5023_p7, %p5022_p4 }
  0x83   : > { %p5025_p1 = pnand %p5024_p13, %p5018_p10 }
  0x85   : > { %5028 = shalt.err (!%p5025_p1)
}
  0x86   : > { %s5029_s23 = scalar_lea.vmem %s5357_s18, 24576  ;;  %s5131_s26 = smov [#allocation8]  }
  0x87   : > { %p5030_p8 = scmp.ne.s32.totalorder %s5357_s18, %s5029_s23  ;;  %s5034_s27 = sshll.u32 %s5131_s26, 4  ;;  %s5035_s27 = int_to_ptr.vmem [resolvable:$false] %s5034_s27 }
  0x88   : > { %s5036_s14 = scalar_lea.vmem %s5035_s27, 49152  ;;  %p5037_p11 = scmp.lt.s32.totalorder %s5357_s18, %s5035_s27 }
  0x89   : > { %p5032_p9 = pnand %p5030_p8, %p5016_p5  ;;  %p5038_p6 = scmp.lt.s32.totalorder %s5036_s14, %s5029_s23 }
  0x8b   : > { %p5033_p2 = pneg %p5032_p9  ;;  %p5039_p12 = por %p5038_p6, %p5037_p11 }
  0x8d   : > { %p5040_p0 = pnand %p5039_p12, %p5033_p2 }
  0x8f   : > { %5043 = shalt.err (!%p5040_p0)
}
  0x90   : > { %4572 = dma.hbm_to_vmem [thread:$0]  (!%p5348_p3), %s5355_s13, 24576, %s5357_s18, %s5359_s10, %s5128_s29, %s5128_s29, %s5129_s30  }
  0x91   : > { %p5930_p5 = scmp.ne.s32.totalorder %s5926_s12, 0 }
  0x92   : > { %p5931_p10 = scmp.eq.s32.totalorder (!%p5930_p5), %s5203_s0, 0 }
  0x93   : > { %248 = sbr.rel (%p5930_p5) target bundleno = 976 (0x3d0), region = 40 }
  0x9a   : > { %5089 = dma.done.wait (%p5931_p10), [#allocation6], 256   ;;  %p5932_p4 = pmov %p5931_p10 }
  0x9b   : > { %s254_s28 = sand.u32 1, %s5203_s0   ;;  %s256_s7 = sand.u32 1, %s5114_s8  }
  0x9c   : > { %5091 = vsyncadd (%p5932_p4), [#allocation6], 4294967040  ;;  %s4533_s16 = smul.u32 1536, %s256_s7  ;;  %s255_s19 = scalar_lea.sflag [#allocation9], %s254_s28 }
  0x9d   : > { %p5933_p7 = scmp.ne.s32.totalorder %s5925_s11, 0 }
  0x9e   : > { %s5398_s20 = scalar_lea.vmem [#allocation8], %s4533_s16 }
  0x9f   : > { %5093 = dma.done.wait (%p5933_p7), %s255_s19, 24576  }
  0xa0   : > { %5095 = vsyncadd (%p5933_p7), %s255_s19, 4294942720  ;;  %p5934_p3 = pmov %p5932_p4 }
  0xa2   : > { %5097 = dma.done.wait (%p5934_p3), [#allocation9], 128   ;;  %p5935_p13 = pmov %p5934_p3 }
  0xa3   : > { %p5936_p1 = pmov %p5934_p3 }
  0xa4   : > { %5099 = vsyncadd (%p5935_p13), [#allocation9], 4294967168 }
  0xa5   : > { %5101 = dma.done.wait (%p5936_p1), [#allocation12], 9344   ;;  %p5937_p8 = pmov %p5936_p1 }
  0xa6   : > { %p5938_p9 = scmp.ne.s32.totalorder %s5203_s0, 0 }
  0xa7   : > { %5103 = vsyncadd (%p5937_p8), [#allocation12], 4294957952  ;;  %v5132_v0 = vmov (!%p5938_p9), 0.0  }
  0xa8   : > { %297 = sbr.rel (%p5938_p9) target bundleno = 175 (0xaf), region = 64  ;;  %298 = vst [vmem:[#allocation2] sm:$0x3] (!%p5938_p9), %v5132_v0 }
  0xaf PF: > { %v4628_v1 = vld [vmem:[%s5398_s20 + $0x40] sm:$0xff]   ;;  %v4632_v5 = vld [vmem:[%s5398_s20 + $0x48] sm:$0xff]   ;;  %v4636_v9 = vld [vmem:[%s5398_s20 + $0x50] sm:$0xff]   ;;  %s302_s11 = smul.u32 3, %s5203_s0  ;;  %v313_v29 = vlaneseq  ;;  %v5133_v40 = vmov 1983009808  }
  0xb0   : > { %v4629_v2 = vld [vmem:[%s5398_s20 + $0xc0] sm:$0xff]   ;;  %3977 = vmatprep.subr.bf16.mxu0 %v4628_v1  ;;  %v4633_v6 = vld [vmem:[%s5398_s20 + $0xc8] sm:$0xff]   ;;  %v4637_v10 = vld [vmem:[%s5398_s20 + $0xd0] sm:$0xff]   ;;  %v311_v41 = vunpack.c.l.s4 %v5133_v40  ;;  %p3891_p2 = scmp.ne.s32.totalorder %s5203_s0, 2 }
  0xb1   : > { %v4630_v3 = vld [vmem:[%s5398_s20] sm:$0xff]   ;;  %3999 = vmatprep.subr.bf16.mxu1 %v4629_v2  ;;  %v4634_v7 = vld [vmem:[%s5398_s20 + $0x8] sm:$0xff]   ;;  %v4638_v11 = vld [vmem:[%s5398_s20 + $0x10] sm:$0xff]   ;;  %s5437_s12 = sld [smem:[#allocation4 + %s302_s11]]  ;;  %s1032_s29 = sadd.s32 1, %s302_s11  ;;  %v5454_v35 = vshrl.u32 %v313_v29, 7 }
  0xb2   : > { %v4631_v4 = vld [vmem:[%s5398_s20 + $0x80] sm:$0xff]   ;;  %3978 = vmatpush3.bf16.msra.mxu0 %v4630_v3  ;;  %v4635_v8 = vld [vmem:[%s5398_s20 + $0x88] sm:$0xff]   ;;  %v4639_v12 = vld [vmem:[%s5398_s20 + $0x90] sm:$0xff]   ;;  %s5443_s30 = sld [smem:[#allocation4 + %s1032_s29]]  ;;  %s1762_s13 = sadd.s32 2, %s302_s11  ;;  %v312_v47 = vunpack.c.0.s8 %v311_v41  ;;  %vm5135_vm0 = vmmov (!%p3891_p2), 0  }
  0xb3   : > { %4000 = vmatpush3.bf16.msra.mxu1 %v4631_v4  ;;  %3979 = vmatprep.subr.bf16.mxu0 %v4632_v5  ;;  %v4640_v13 = vld [vmem:[%s5398_s20 + $0x58] sm:$0xff]   ;;  %v4644_v17 = vld [vmem:[%s5398_s20 + $0x60] sm:$0xff]   ;;  %v4648_v21 = vld [vmem:[%s5398_s20 + $0x68] sm:$0xff]   ;;  %s5448_s18 = sld [smem:[#allocation4 + %s1762_s13]] }
  0xb4   : > { %4001 = vmatprep.subr.bf16.mxu1 %v4633_v6  ;;  %v4641_v14 = vld [vmem:[%s5398_s20 + $0xd8] sm:$0xff]   ;;  %v4645_v18 = vld [vmem:[%s5398_s20 + $0xe0] sm:$0xff]   ;;  %v4649_v22 = vld [vmem:[%s5398_s20 + $0xe8] sm:$0xff]   ;;  %v5473_v52 = vsub.s32 %v312_v47, %v5454_v35  ;;  %s2497_s10 = sld [smem:[#allocation4]] (!%p3891_p2)  ;;  %s3892_s21 = sld [smem:[#allocation4 + $0x1]] (!%p3891_p2) }
  0xb5   : > { %v4642_v15 = vld [vmem:[%s5398_s20 + $0x18] sm:$0xff]   ;;  %v4646_v19 = vld [vmem:[%s5398_s20 + $0x20] sm:$0xff]   ;;  %v4650_v23 = vld [vmem:[%s5398_s20 + $0x28] sm:$0xff]   ;;  %s3893_s15 = sld [smem:[#allocation4 + $0x2]] (!%p3891_p2)  ;;  %s3894_s22 = sld [smem:[#allocation4 + $0x3]] (!%p3891_p2) }
  0xb6   : > { %3980 = vmatpush3.bf16.msra.mxu0 %v4634_v7  ;;  %v4643_v16 = vld [vmem:[%s5398_s20 + $0x98] sm:$0xff]   ;;  %v4647_v20 = vld [vmem:[%s5398_s20 + $0xa0] sm:$0xff]   ;;  %v4651_v24 = vld [vmem:[%s5398_s20 + $0xa8] sm:$0xff]   ;;  %s3895_s24 = sld [smem:[#allocation4 + $0x4]] (!%p3891_p2)  ;;  %s3896_s23 = sld [smem:[#allocation4 + $0x5]] (!%p3891_p2) }
  0xb7   : > { %4002 = vmatpush3.bf16.msra.mxu1 %v4635_v8  ;;  %3981 = vmatprep.subr.bf16.mxu0 %v4636_v9  ;;  %v4652_v25 = vld [vmem:[%s5398_s20 + $0x70] sm:$0xff]   ;;  %v4656_v30 = vld [vmem:[%s5398_s20 + $0x78] sm:$0xff]   ;;  %v304_v33 = vstv %s5437_s12  ;;  %v4660_v42 = vld [vmem:[%s5398_s20 + $0x140] sm:$0xff]   ;;  %s5727_s26 = sld [smem:[#allocation4 + $0x6]] (!%p3891_p2)  ;;  %s5730_s27 = sld [smem:[#allocation4 + $0x7]] (!%p3891_p2) }
  0xb8   : > { %4003 = vmatprep.subr.bf16.mxu1 %v4637_v10  ;;  %v4653_v26 = vld [vmem:[%s5398_s20 + $0xf0] sm:$0xff]   ;;  %v4657_v31 = vld [vmem:[%s5398_s20 + $0xf8] sm:$0xff]   ;;  %v1034_v43 = vstv %s5443_s30  ;;  %v4661_v44 = vld [vmem:[%s5398_s20 + $0x1c0] sm:$0xff]   ;;  %s3899_s14 = sld [smem:[#allocation4 + $0x8]] (!%p3891_p2) }
  0xb9   : > { %v4654_v27 = vld [vmem:[%s5398_s20 + $0x30] sm:$0xff]   ;;  %v4658_v32 = vld [vmem:[%s5398_s20 + $0x38] sm:$0xff]   ;;  %v1764_v46 = vstv %s5448_s18  ;;  %v4662_v61 = vld [vmem:[%s5398_s20 + $0x100] sm:$0xff]  }
  0xba   : > { %3982 = vmatpush3.bf16.msra.mxu0 %v4638_v11  ;;  %v4655_v28 = vld [vmem:[%s5398_s20 + $0xb0] sm:$0xff]   ;;  %v4659_v34 = vld [vmem:[%s5398_s20 + $0xb8] sm:$0xff]   ;;  %v4663_v0 = vld [vmem:[%s5398_s20 + $0x180] sm:$0xff]  }
  0xbb   : > { %4004 = vmatpush3.bf16.msra.mxu1 %v4639_v12  ;;  %3983 = vmatprep.subr.bf16.mxu0 %v4640_v13  ;;  %v5456_v36 = vld [vmem:[#allocation5] sm:$0xff]  ;;  %v5458_v37 = vld [vmem:[#allocation5 + $0x8] sm:$0xff]  ;;  %v4664_v5 = vld [vmem:[%s5398_s20 + $0x148] sm:$0xff]  }
  0xbc   : > { %4005 = vmatprep.subr.bf16.mxu1 %v4641_v14  ;;  %v305_v38 = vmul.f32 %v304_v33, %v5456_v36  ;;  %v306_v39 = vmul.f32 %v304_v33, %v5458_v37  ;;  %v1036_v45 = vmul.f32 %v1034_v43, %v5458_v37  ;;  %v1765_v51 = vmul.f32 %v1764_v46, %v5456_v36  ;;  %v4665_v7 = vld [vmem:[%s5398_s20 + $0x1c8] sm:$0xff]   ;;  %v4668_v12 = vld [vmem:[%s5398_s20 + $0x150] sm:$0xff]   ;;  %v4689_v40 = vld [vmem:[%s5398_s20 + $0x1f8] sm:$0xff]  }
  0xbd   : > { %v4666_v8 = vld [vmem:[%s5398_s20 + $0x108] sm:$0xff]   ;;  %v1035_v29 = vmul.f32 %v1034_v43, %v5456_v36  ;;  %v4686_v33 = vld [vmem:[%s5398_s20 + $0x130] sm:$0xff]   ;;  %v1766_v36 = vmul.f32 %v1764_v46, %v5458_v37  ;;  %v4690_v41 = vld [vmem:[%s5398_s20 + $0x138] sm:$0xff]  }
  0xbe   : > { %3984 = vmatpush3.bf16.msra.mxu0 %v4642_v15  ;;  %v309_v48 = vcombine.high %v305_v38, %v305_v38  ;;  %v326_v49 = vcombine.high %v306_v39, %v306_v39  ;;  %v1056_v50 = vcombine.high %v1036_v45, %v1036_v45  ;;  %v316_v53 = vrot.slane %v305_v38, %v5473_v52  ;;  %v4667_v11 = vld [vmem:[%s5398_s20 + $0x188] sm:$0xff]   ;;  %v4669_v15 = vld [vmem:[%s5398_s20 + $0x1d0] sm:$0xff]   ;;  %v4692_v47 = vld [vmem:[%s5398_s20 + $0x240] sm:$0xff]  }
  0xbf   : > { %4006 = vmatpush3.bf16.msra.mxu1 %v4643_v16  ;;  %3985 = vmatprep.subr.bf16.mxu0 %v4644_v17  ;;  %v5478_v55 = vrot.slane %v306_v39, %v5473_v52  ;;  %v5484_v57 = vrot.slane %v1036_v45, %v5473_v52  ;;  %v1769_v6 = vcombine.high %v1765_v51, %v1765_v51  ;;  %v4670_v16 = vld [vmem:[%s5398_s20 + $0x110] sm:$0xff]   ;;  %v4688_v39 = vld [vmem:[%s5398_s20 + $0x178] sm:$0xff]  }
  0xc0   : > { %4007 = vmatprep.subr.bf16.mxu1 %v4645_v18  ;;  %v323_v54 = vrot.slane %v309_v48, %v5473_v52  ;;  %v5481_v56 = vrot.slane %v326_v49, %v5473_v52  ;;  %v5487_v58 = vrot.slane %v1056_v50, %v5473_v52  ;;  %v324_v59 = vcombine.high %v316_v53, %v316_v53  ;;  %v4671_v17 = vld [vmem:[%s5398_s20 + $0x190] sm:$0xff]   ;;  %v4672_v18 = vld [vmem:[%s5398_s20 + $0x158] sm:$0xff]   ;;  %v4693_v48 = vld [vmem:[%s5398_s20 + $0x2c0] sm:$0xff]  }
  0xc1   : > { %v351_v62 = vpack.c.bf16 %v316_v53, %v316_v53  ;;  %v341_v1 = vcombine.high %v5478_v55, %v5478_v55  ;;  %v5501_v13 = vrot.slane %v1765_v51, %v5473_v52  ;;  %v5504_v14 = vrot.slane %v1769_v6, %v5473_v52  ;;  %v4687_v38 = vld [vmem:[%s5398_s20 + $0x1b0] sm:$0xff]   ;;  %v4691_v45 = vld [vmem:[%s5398_s20 + $0x1b8] sm:$0xff]   ;;  %v4694_v49 = vld [vmem:[%s5398_s20 + $0x200] sm:$0xff]  }
  0xc2   : > { %3986 = vmatpush3.bf16.msra.mxu0 %v4646_v19  ;;  %v325_v60 = vcombine.high %v323_v54, %v323_v54  ;;  %v353_v63 = vpack.c.bf16 %v323_v54, %v323_v54  ;;  %v342_v2 = vcombine.high %v5481_v56, %v5481_v56  ;;  %v352_v3 = vpack.c.bf16 %v324_v59, %v324_v59  ;;  %v4673_v19 = vld [vmem:[%s5398_s20 + $0x1d8] sm:$0xff]   ;;  %v4696_v59 = vld [vmem:[%s5398_s20 + $0x248] sm:$0xff]  }
  0xc3   : > { %4008 = vmatpush3.bf16.msra.mxu1 %v4647_v20  ;;  %3987 = vmatprep.subr.bf16.mxu0 %v4648_v21  ;;  %v356_v9 = vpack.c.bf16 %v341_v1, %v341_v1  ;;  %v4674_v20 = vld [vmem:[%s5398_s20 + $0x118] sm:$0xff]   ;;  %v5543_v37 = vrot.slane %v1766_v36, %v5473_v52  ;;  %v355_v53 = vpack.c.bf16 %v5478_v55, %v5478_v55  ;;  %v4699_v55 = vld [vmem:[%s5398_s20 + $0x288] sm:$0xff]   ;;  %v4702_v1 = vld [vmem:[%s5398_s20 + $0x210] sm:$0xff]  }
  0xc4   : > { %4009 = vmatprep.subr.bf16.mxu1 %v4649_v22  ;;  %v354_v4 = vpack.c.bf16 %v325_v60, %v325_v60  ;;  %903 = vmatprep.mubr.bf16.mxu0 %v352_v3  ;;  %v358_v10 = vpack.c.bf16 %v342_v2, %v342_v2  ;;  %v4675_v21 = vld [vmem:[%s5398_s20 + $0x198] sm:$0xff]   ;;  %v4676_v22 = vld [vmem:[%s5398_s20 + $0x160] sm:$0xff]   ;;  %v357_v54 = vpack.c.bf16 %v5481_v56, %v5481_v56  ;;  %v4697_v60 = vld [vmem:[%s5398_s20 + $0x2c8] sm:$0xff]  }
  0xc5   : > { %v4700_v56 = vld [vmem:[%s5398_s20 + $0x250] sm:$0xff]   ;;  %v4704_v3 = vld [vmem:[%s5398_s20 + $0x258] sm:$0xff]  }
  0xc6   : > { %3988 = vmatpush3.bf16.msra.mxu0 %v4650_v23  ;;  %943 = vmatprep.mubr.bf16.mxu1 %v354_v4  ;;  %v4677_v23 = vld [vmem:[%s5398_s20 + $0x1e0] sm:$0xff]   ;;  %v4703_v2 = vld [vmem:[%s5398_s20 + $0x290] sm:$0xff]   ;;  %v4705_v4 = vld [vmem:[%s5398_s20 + $0x2d8] sm:$0xff]  }
  0xc7   : > { %4010 = vmatpush3.bf16.msra.mxu1 %v4651_v24  ;;  %3989 = vmatprep.subr.bf16.mxu0 %v4652_v25  ;;  %v4678_v24 = vld [vmem:[%s5398_s20 + $0x120] sm:$0xff]   ;;  %v4707_v6 = vld [vmem:[%s5398_s20 + $0x298] sm:$0xff]  }
  0xc8   : > { %4011 = vmatprep.subr.bf16.mxu1 %v4653_v26  ;;  %v4679_v25 = vld [vmem:[%s5398_s20 + $0x1a0] sm:$0xff]   ;;  %v4680_v26 = vld [vmem:[%s5398_s20 + $0x168] sm:$0xff]  }
  0xca   : > { %3990 = vmatpush3.bf16.msra.mxu0 %v4654_v27  ;;  %v4681_v27 = vld [vmem:[%s5398_s20 + $0x1e8] sm:$0xff]  }
  0xcb   : > { %4012 = vmatpush3.bf16.msra.mxu1 %v4655_v28  ;;  %3991 = vmatprep.subr.bf16.mxu0 %v4656_v30  ;;  %v4682_v28 = vld [vmem:[%s5398_s20 + $0x128] sm:$0xff]  }
  0xcc   : > { %4013 = vmatprep.subr.bf16.mxu1 %v4657_v31  ;;  %v4683_v30 = vld [vmem:[%s5398_s20 + $0x1a8] sm:$0xff]   ;;  %v4684_v31 = vld [vmem:[%s5398_s20 + $0x170] sm:$0xff]  }
  0xce   : > { %3992 = vmatpush3.bf16.msra.mxu0 %v4658_v32  ;;  %v4685_v32 = vld [vmem:[%s5398_s20 + $0x1f0] sm:$0xff]  }
  0xcf   : > { %4014 = vmatpush3.bf16.msra.mxu1 %v4659_v34  ;;  %4021 = vmatprep.subr.bf16.mxu0 %v4660_v42  ;;  %v1039_v34 = vcombine.high %v1035_v29, %v1035_v29  ;;  %v5535_v42 = vrot.slane %v1035_v29, %v5473_v52  ;;  %v1072_v29 = vcombine.high %v5487_v58, %v5487_v58 }
  0xd0   : > { %4043 = vmatprep.subr.bf16.mxu1 %v4661_v44  ;;  %v1786_v44 = vcombine.high %v1766_v36, %v1766_v36 }
  0xd1   : > { %904 = vmatmul.mubr.bf16.vlgmr.msra.gmra.mrb[0].mxu0 %v351_v62  ;;  %v5538_v43 = vrot.slane %v1039_v34, %v5473_v52  ;;  %v1054_v50 = vcombine.high %v5535_v42, %v5535_v42  ;;  %v4729_v34 = vld [vmem:[%s5398_s20 + $0x3c8] sm:$0xff]   ;;  %v1088_v36 = vpack.c.bf16 %v1072_v29, %v1072_v29  ;;  %v4775_v29 = vld [vmem:[%s5398_s20 + $0x4a0] sm:$0xff]  }
  0xd2   : > { %944 = vmatmul.mubr.bf16.vlgmr.msra.gmra.mrb[0].mxu1 %v353_v63  ;;  %4022 = vmatpush3.bf16.msra.mxu0 %v4662_v61  ;;  %v5546_v46 = vrot.slane %v1786_v44, %v5473_v52  ;;  %v4695_v52 = vld [vmem:[%s5398_s20 + $0x280] sm:$0xff]   ;;  %v4698_v61 = vld [vmem:[%s5398_s20 + $0x208] sm:$0xff]   ;;  %v4735_v44 = vld [vmem:[%s5398_s20 + $0x390] sm:$0xff]  }
  0xd3   : > { %4044 = vmatpush3.bf16.msra.mxu1 %v4663_v0  ;;  %4023 = vmatprep.subr.bf16.mxu0 %v4664_v5  ;;  %v1055_v51 = vcombine.high %v5538_v43, %v5538_v43  ;;  %v1082_v62 = vpack.c.bf16 %v1054_v50, %v1054_v50  ;;  %v4701_v0 = vld [vmem:[%s5398_s20 + $0x2d0] sm:$0xff]   ;;  %v4706_v5 = vld [vmem:[%s5398_s20 + $0x218] sm:$0xff]   ;;  %v4740_v50 = vld [vmem:[%s5398_s20 + $0x360] sm:$0xff]  }
  0xd4   : > { %4045 = vmatprep.subr.bf16.mxu1 %v4665_v7  ;;  %983 = vmatprep.mubr.bf16.mxu0 %v356_v9  ;;  %v4708_v7 = vld [vmem:[%s5398_s20 + $0x260] sm:$0xff]  }
  0xd5   : > { %1023 = vmatprep.mubr.bf16.mxu1 %v358_v10  ;;  %v1084_v63 = vpack.c.bf16 %v1055_v51, %v1055_v51  ;;  %v4710_v9 = vld [vmem:[%s5398_s20 + $0x220] sm:$0xff]  }
  0xd6   : > { %4024 = vmatpush3.bf16.msra.mxu0 %v4666_v8  ;;  %v4709_v8 = vld [vmem:[%s5398_s20 + $0x2e0] sm:$0xff]  }
  0xd7   : > { %4046 = vmatpush3.bf16.msra.mxu1 %v4667_v11  ;;  %4025 = vmatprep.subr.bf16.mxu0 %v4668_v12  ;;  %v4711_v10 = vld [vmem:[%s5398_s20 + $0x2a0] sm:$0xff]   ;;  %v4712_v11 = vld [vmem:[%s5398_s20 + $0x268] sm:$0xff]  }
  0xd8   : > { %4047 = vmatprep.subr.bf16.mxu1 %v4669_v15  ;;  %v4713_v12 = vld [vmem:[%s5398_s20 + $0x2e8] sm:$0xff]   ;;  %v4741_v51 = vld [vmem:[%s5398_s20 + $0x3e0] sm:$0xff]  }
  0xd9   : > { %v4714_v15 = vld [vmem:[%s5398_s20 + $0x228] sm:$0xff]  }
  0xda   : > { %4026 = vmatpush3.bf16.msra.mxu0 %v4670_v16  ;;  %v4715_v16 = vld [vmem:[%s5398_s20 + $0x2a8] sm:$0xff]  }
  0xdb   : > { %4048 = vmatpush3.bf16.msra.mxu1 %v4671_v17  ;;  %4027 = vmatprep.subr.bf16.mxu0 %v4672_v18  ;;  %v4716_v17 = vld [vmem:[%s5398_s20 + $0x270] sm:$0xff]  }
  0xdc   : > { %4049 = vmatprep.subr.bf16.mxu1 %v4673_v19  ;;  %v4717_v18 = vld [vmem:[%s5398_s20 + $0x2f0] sm:$0xff]  }
  0xdd   : > { %v4718_v19 = vld [vmem:[%s5398_s20 + $0x230] sm:$0xff]  }
  0xde   : > { %4028 = vmatpush3.bf16.msra.mxu0 %v4674_v20  ;;  %v4719_v20 = vld [vmem:[%s5398_s20 + $0x2b0] sm:$0xff]  }
  0xdf   : > { %4050 = vmatpush3.bf16.msra.mxu1 %v4675_v21  ;;  %4029 = vmatprep.subr.bf16.mxu0 %v4676_v22  ;;  %v4720_v21 = vld [vmem:[%s5398_s20 + $0x278] sm:$0xff]  }
  0xe0   : > { %4051 = vmatprep.subr.bf16.mxu1 %v4677_v23  ;;  %v4721_v22 = vld [vmem:[%s5398_s20 + $0x2f8] sm:$0xff]  }
  0xe1   : > { %v4722_v23 = vld [vmem:[%s5398_s20 + $0x238] sm:$0xff]  }
  0xe2   : > { %4030 = vmatpush3.bf16.msra.mxu0 %v4678_v24  ;;  %v4723_v24 = vld [vmem:[%s5398_s20 + $0x2b8] sm:$0xff]  }
  0xe3   : > { %4052 = vmatpush3.bf16.msra.mxu1 %v4679_v25  ;;  %4031 = vmatprep.subr.bf16.mxu0 %v4680_v26  ;;  %v4724_v25 = vld [vmem:[%s5398_s20 + $0x340] sm:$0xff]  }
  0xe4   : > { %4053 = vmatprep.subr.bf16.mxu1 %v4681_v27  ;;  %v4725_v26 = vld [vmem:[%s5398_s20 + $0x3c0] sm:$0xff]  }
  0xe5   : > { %v4726_v27 = vld [vmem:[%s5398_s20 + $0x300] sm:$0xff]  }
  0xe6   : > { %4032 = vmatpush3.bf16.msra.mxu0 %v4682_v28  ;;  %v1071_v28 = vcombine.high %v5484_v57, %v5484_v57 }
  0xe7   : > { %4054 = vmatpush3.bf16.msra.mxu1 %v4683_v30  ;;  %4033 = vmatprep.subr.bf16.mxu0 %v4684_v31  ;;  %v1081_v30 = vpack.c.bf16 %v5535_v42, %v5535_v42  ;;  %v1083_v31 = vpack.c.bf16 %v5538_v43, %v5538_v43  ;;  %v4733_v42 = vld [vmem:[%s5398_s20 + $0x3d0] sm:$0xff]  }
  0xe8   : > { %4055 = vmatprep.subr.bf16.mxu1 %v4685_v32  ;;  %v4727_v32 = vld [vmem:[%s5398_s20 + $0x380] sm:$0xff]   ;;  %v4734_v43 = vld [vmem:[%s5398_s20 + $0x310] sm:$0xff]  }
  0xea   : > { %4034 = vmatpush3.bf16.msra.mxu0 %v4686_v33  ;;  %v4728_v33 = vld [vmem:[%s5398_s20 + $0x348] sm:$0xff]  }
  0xeb   : > { %4056 = vmatpush3.bf16.msra.mxu1 %v4687_v38  ;;  %4035 = vmatprep.subr.bf16.mxu0 %v4688_v39  ;;  %v4730_v38 = vld [vmem:[%s5398_s20 + $0x308] sm:$0xff]   ;;  %v1086_v39 = vpack.c.bf16 %v1071_v28, %v1071_v28  ;;  %v4774_v28 = vld [vmem:[%s5398_s20 + $0x420] sm:$0xff]  }
  0xec   : > { %4057 = vmatprep.subr.bf16.mxu1 %v4689_v40  ;;  %v4731_v40 = vld [vmem:[%s5398_s20 + $0x388] sm:$0xff]  }
  0xee   : > { %4036 = vmatpush3.bf16.msra.mxu0 %v4690_v41  ;;  %v4732_v41 = vld [vmem:[%s5398_s20 + $0x350] sm:$0xff]  }
  0xef   : > { %4058 = vmatpush3.bf16.msra.mxu1 %v4691_v45  ;;  %4065 = vmatprep.subr.bf16.mxu0 %v4692_v47  ;;  %v4736_v45 = vld [vmem:[%s5398_s20 + $0x358] sm:$0xff]  }
  0xf0   : > { %4087 = vmatprep.subr.bf16.mxu1 %v4693_v48  ;;  %v4737_v47 = vld [vmem:[%s5398_s20 + $0x3d8] sm:$0xff]  }
  0xf1   : > { %984 = vmatmul.mubr.bf16.vlgmr.msra.gmra.mrb[4].mxu0 %v355_v53  ;;  %v4738_v48 = vld [vmem:[%s5398_s20 + $0x318] sm:$0xff]   ;;  %v4742_v53 = vld [vmem:[%s5398_s20 + $0x320] sm:$0xff]  }
  0xf2   : > { %1024 = vmatmul.mubr.bf16.vlgmr.msra.gmra.mrb[4].mxu1 %v357_v54  ;;  %4066 = vmatpush3.bf16.msra.mxu0 %v4694_v49  ;;  %v4739_v49 = vld [vmem:[%s5398_s20 + $0x398] sm:$0xff]   ;;  %v4743_v54 = vld [vmem:[%s5398_s20 + $0x3a0] sm:$0xff]  }
  0xf3   : > { %4088 = vmatpush3.bf16.msra.mxu1 %v4695_v52  ;;  %4067 = vmatprep.subr.bf16.mxu0 %v4696_v59  ;;  %v4744_v52 = vld [vmem:[%s5398_s20 + $0x368] sm:$0xff]  }
  0xf4   : > { %4089 = vmatprep.subr.bf16.mxu1 %v4697_v60  ;;  %1633 = vmatprep.mubr.bf16.mxu0 %v1082_v62  ;;  %v4745_v59 = vld [vmem:[%s5398_s20 + $0x3e8] sm:$0xff]   ;;  %v4748_v62 = vld [vmem:[%s5398_s20 + $0x370] sm:$0xff]  }
  0xf5   : > { %1673 = vmatprep.mubr.bf16.mxu1 %v1084_v63  ;;  %v4746_v60 = vld [vmem:[%s5398_s20 + $0x328] sm:$0xff]   ;;  %v4749_v63 = vld [vmem:[%s5398_s20 + $0x3f0] sm:$0xff]  }
  0xf6   : > { %4068 = vmatpush3.bf16.msra.mxu0 %v4698_v61  ;;  %v4747_v61 = vld [vmem:[%s5398_s20 + $0x3a8] sm:$0xff]  }
  0xf7   : > { %4090 = vmatpush3.bf16.msra.mxu1 %v4699_v55  ;;  %4069 = vmatprep.subr.bf16.mxu0 %v4700_v56  ;;  %v4750_v55 = vld [vmem:[%s5398_s20 + $0x330] sm:$0xff]  }
  0xf8   : > { %4091 = vmatprep.subr.bf16.mxu1 %v4701_v0  ;;  %v4751_v56 = vld [vmem:[%s5398_s20 + $0x3b0] sm:$0xff]   ;;  %v4752_v0 = vld [vmem:[%s5398_s20 + $0x378] sm:$0xff]  }
  0xfa   : > { %4070 = vmatpush3.bf16.msra.mxu0 %v4702_v1  ;;  %v4753_v1 = vld [vmem:[%s5398_s20 + $0x3f8] sm:$0xff]  }
  0xfb   : > { %4092 = vmatpush3.bf16.msra.mxu1 %v4703_v2  ;;  %4071 = vmatprep.subr.bf16.mxu0 %v4704_v3  ;;  %v4754_v2 = vld [vmem:[%s5398_s20 + $0x338] sm:$0xff]  }
  0xfc   : > { %4093 = vmatprep.subr.bf16.mxu1 %v4705_v4  ;;  %v4755_v3 = vld [vmem:[%s5398_s20 + $0x3b8] sm:$0xff]   ;;  %v4756_v4 = vld [vmem:[%s5398_s20 + $0x440] sm:$0xff]  }
  0xfe   : > { %4072 = vmatpush3.bf16.msra.mxu0 %v4706_v5  ;;  %v4757_v5 = vld [vmem:[%s5398_s20 + $0x4c0] sm:$0xff]  }
  0xff   : > { %4094 = vmatpush3.bf16.msra.mxu1 %v4707_v6  ;;  %4073 = vmatprep.subr.bf16.mxu0 %v4708_v7  ;;  %v4758_v6 = vld [vmem:[%s5398_s20 + $0x400] sm:$0xff]   ;;  %v1784_v7 = vcombine.high %v5501_v13, %v5501_v13 }
 0x100   : > { %4095 = vmatprep.subr.bf16.mxu1 %v4709_v8  ;;  %v1785_v8 = vcombine.high %v5504_v14, %v5504_v14 }
 0x102   : > { %4074 = vmatpush3.bf16.msra.mxu0 %v4710_v9  ;;  %v1085_v9 = vpack.c.bf16 %v5484_v57, %v5484_v57  ;;  %v4763_v57 = vld [vmem:[%s5398_s20 + $0x488] sm:$0xff]  }
 0x103   : > { %4096 = vmatpush3.bf16.msra.mxu1 %v4711_v10  ;;  %4075 = vmatprep.subr.bf16.mxu0 %v4712_v11  ;;  %v1087_v10 = vpack.c.bf16 %v5487_v58, %v5487_v58  ;;  %v4759_v11 = vld [vmem:[%s5398_s20 + $0x480] sm:$0xff]   ;;  %v4764_v58 = vld [vmem:[%s5398_s20 + $0x450] sm:$0xff]  }
 0x104   : > { %4097 = vmatprep.subr.bf16.mxu1 %v4713_v12  ;;  %v4760_v12 = vld [vmem:[%s5398_s20 + $0x448] sm:$0xff]  }
 0x106   : > { %4076 = vmatpush3.bf16.msra.mxu0 %v4714_v15  ;;  %v4761_v15 = vld [vmem:[%s5398_s20 + $0x4c8] sm:$0xff]  }
 0x107   : > { %4098 = vmatpush3.bf16.msra.mxu1 %v4715_v16  ;;  %4077 = vmatprep.subr.bf16.mxu0 %v4716_v17  ;;  %v4762_v16 = vld [vmem:[%s5398_s20 + $0x408] sm:$0xff]   ;;  %v1812_v17 = vpack.c.bf16 %v1784_v7, %v1784_v7 }
 0x108   : > { %4099 = vmatprep.subr.bf16.mxu1 %v4717_v18  ;;  %v1814_v18 = vpack.c.bf16 %v1785_v8, %v1785_v8  ;;  %v4808_v7 = vld [vmem:[%s5398_s20 + $0x568] sm:$0xff]  }
 0x109   : > { %v4809_v8 = vld [vmem:[%s5398_s20 + $0x5e8] sm:$0xff]  }
 0x10a   : > { %4078 = vmatpush3.bf16.msra.mxu0 %v4718_v19  ;;  %v4765_v19 = vld [vmem:[%s5398_s20 + $0x4d0] sm:$0xff]  }
 0x10b   : > { %4100 = vmatpush3.bf16.msra.mxu1 %v4719_v20  ;;  %4079 = vmatprep.subr.bf16.mxu0 %v4720_v21  ;;  %v4766_v20 = vld [vmem:[%s5398_s20 + $0x410] sm:$0xff]  }
 0x10c   : > { %4101 = vmatprep.subr.bf16.mxu1 %v4721_v22  ;;  %v4767_v21 = vld [vmem:[%s5398_s20 + $0x490] sm:$0xff]   ;;  %v4768_v22 = vld [vmem:[%s5398_s20 + $0x458] sm:$0xff]  }
 0x10e   : > { %4080 = vmatpush3.bf16.msra.mxu0 %v4722_v23  ;;  %v4769_v23 = vld [vmem:[%s5398_s20 + $0x4d8] sm:$0xff]  }
 0x10f   : > { %4102 = vmatpush3.bf16.msra.mxu1 %v4723_v24  ;;  %4109 = vmatprep.subr.bf16.mxu0 %v4724_v25  ;;  %v4770_v24 = vld [vmem:[%s5398_s20 + $0x418] sm:$0xff]  }
 0x110   : > { %4131 = vmatprep.subr.bf16.mxu1 %v4725_v26  ;;  %v4771_v25 = vld [vmem:[%s5398_s20 + $0x498] sm:$0xff]   ;;  %v4772_v26 = vld [vmem:[%s5398_s20 + $0x460] sm:$0xff]  }
 0x111   : > { %1634 = vmatmul.mubr.bf16.vlgmr.msra.gmra.mrb[8].mxu0 %v1081_v30  ;;  %v4776_v30 = vld [vmem:[%s5398_s20 + $0x468] sm:$0xff]  }
 0x112   : > { %1674 = vmatmul.mubr.bf16.vlgmr.msra.gmra.mrb[8].mxu1 %v1083_v31  ;;  %4110 = vmatpush3.bf16.msra.mxu0 %v4726_v27  ;;  %v4773_v27 = vld [vmem:[%s5398_s20 + $0x4e0] sm:$0xff]   ;;  %v4777_v31 = vld [vmem:[%s5398_s20 + $0x4e8] sm:$0xff]  }
 0x113   : > { %4132 = vmatpush3.bf16.msra.mxu1 %v4727_v32  ;;  %4111 = vmatprep.subr.bf16.mxu0 %v4728_v33  ;;  %v4778_v32 = vld [vmem:[%s5398_s20 + $0x428] sm:$0xff]  }
 0x114   : > { %4133 = vmatprep.subr.bf16.mxu1 %v4729_v34  ;;  %1713 = vmatprep.mubr.bf16.mxu0 %v1086_v39  ;;  %v4779_v33 = vld [vmem:[%s5398_s20 + $0x4a8] sm:$0xff]   ;;  %v4780_v34 = vld [vmem:[%s5398_s20 + $0x470] sm:$0xff]  }
 0x115   : > { %1753 = vmatprep.mubr.bf16.mxu1 %v1088_v36  ;;  %v4782_v39 = vld [vmem:[%s5398_s20 + $0x430] sm:$0xff]  }
 0x116   : > { %4112 = vmatpush3.bf16.msra.mxu0 %v4730_v38  ;;  %v4781_v38 = vld [vmem:[%s5398_s20 + $0x4f0] sm:$0xff]  }
 0x117   : > { %4134 = vmatpush3.bf16.msra.mxu1 %v4731_v40  ;;  %4113 = vmatprep.subr.bf16.mxu0 %v4732_v41  ;;  %v4783_v36 = vld [vmem:[%s5398_s20 + $0x4b0] sm:$0xff]   ;;  %v4784_v40 = vld [vmem:[%s5398_s20 + $0x478] sm:$0xff]  }
 0x118   : > { %4135 = vmatprep.subr.bf16.mxu1 %v4733_v42  ;;  %v4785_v41 = vld [vmem:[%s5398_s20 + $0x4f8] sm:$0xff]  }
 0x119   : > { %v4786_v42 = vld [vmem:[%s5398_s20 + $0x438] sm:$0xff]  }
 0x11a   : > { %4114 = vmatpush3.bf16.msra.mxu0 %v4734_v43  ;;  %v4787_v43 = vld [vmem:[%s5398_s20 + $0x4b8] sm:$0xff]  }
 0x11b   : > { %4136 = vmatpush3.bf16.msra.mxu1 %v4735_v44  ;;  %4115 = vmatprep.subr.bf16.mxu0 %v4736_v45  ;;  %v4788_v44 = vld [vmem:[%s5398_s20 + $0x540] sm:$0xff]  }
 0x11c   : > { %4137 = vmatprep.subr.bf16.mxu1 %v4737_v47  ;;  %v4789_v45 = vld [vmem:[%s5398_s20 + $0x5c0] sm:$0xff]  }
 0x11d   : > { %v4790_v47 = vld [vmem:[%s5398_s20 + $0x500] sm:$0xff]  }
 0x11e   : > { %4116 = vmatpush3.bf16.msra.mxu0 %v4738_v48  ;;  %v1801_v48 = vcombine.high %v5543_v37, %v5543_v37 }
 0x11f   : > { %4138 = vmatpush3.bf16.msra.mxu1 %v4739_v49  ;;  %4117 = vmatprep.subr.bf16.mxu0 %v4740_v50  ;;  %v1802_v49 = vcombine.high %v5546_v46, %v5546_v46  ;;  %v1811_v50 = vpack.c.bf16 %v5501_v13, %v5501_v13  ;;  %v4795_v13 = vld [vmem:[%s5398_s20 + $0x588] sm:$0xff]  }
 0x120   : > { %4139 = vmatprep.subr.bf16.mxu1 %v4741_v51  ;;  %v1813_v51 = vpack.c.bf16 %v5504_v14, %v5504_v14  ;;  %v4796_v14 = vld [vmem:[%s5398_s20 + $0x550] sm:$0xff]  }
 0x122   : > { %4118 = vmatpush3.bf16.msra.mxu0 %v4742_v53  ;;  %v4791_v53 = vld [vmem:[%s5398_s20 + $0x580] sm:$0xff]  }
 0x123   : > { %4140 = vmatpush3.bf16.msra.mxu1 %v4743_v54  ;;  %4119 = vmatprep.subr.bf16.mxu0 %v4744_v52  ;;  %v4792_v54 = vld [vmem:[%s5398_s20 + $0x548] sm:$0xff]  }
 0x124   : > { %4141 = vmatprep.subr.bf16.mxu1 %v4745_v59  ;;  %v4793_v52 = vld [vmem:[%s5398_s20 + $0x5c8] sm:$0xff]  }
 0x125   : > { %v4794_v59 = vld [vmem:[%s5398_s20 + $0x508] sm:$0xff]  }
 0x126   : > { %4120 = vmatpush3.bf16.msra.mxu0 %v4746_v60  ;;  %v1816_v60 = vpack.c.bf16 %v1801_v48, %v1801_v48 }
 0x127   : > { %4142 = vmatpush3.bf16.msra.mxu1 %v4747_v61  ;;  %4121 = vmatprep.subr.bf16.mxu0 %v4748_v62  ;;  %v1818_v61 = vpack.c.bf16 %v1802_v49, %v1802_v49  ;;  %v4797_v62 = vld [vmem:[%s5398_s20 + $0x5d0] sm:$0xff]  }
 0x128   : > { %4143 = vmatprep.subr.bf16.mxu1 %v4749_v63  ;;  %v4798_v63 = vld [vmem:[%s5398_s20 + $0x510] sm:$0xff]  }
 0x12a   : > { %4122 = vmatpush3.bf16.msra.mxu0 %v4750_v55  ;;  %v4799_v55 = vld [vmem:[%s5398_s20 + $0x590] sm:$0xff]  }
 0x12b   : > { %4144 = vmatpush3.bf16.msra.mxu1 %v4751_v56  ;;  %4123 = vmatprep.subr.bf16.mxu0 %v4752_v0  ;;  %v4800_v56 = vld [vmem:[%s5398_s20 + $0x558] sm:$0xff]  }
 0x12c   : > { %4145 = vmatprep.subr.bf16.mxu1 %v4753_v1  ;;  %v4801_v0 = vld [vmem:[%s5398_s20 + $0x5d8] sm:$0xff]  }
 0x12d   : > { %v4802_v1 = vld [vmem:[%s5398_s20 + $0x518] sm:$0xff]  }
 0x12e   : > { %4124 = vmatpush3.bf16.msra.mxu0 %v4754_v2  ;;  %v4803_v2 = vld [vmem:[%s5398_s20 + $0x598] sm:$0xff]  }
 0x12f   : > { %4146 = vmatpush3.bf16.msra.mxu1 %v4755_v3  ;;  %4153 = vmatprep.subr.bf16.mxu0 %v4756_v4  ;;  %v4804_v3 = vld [vmem:[%s5398_s20 + $0x560] sm:$0xff]  }
 0x130   : > { %4175 = vmatprep.subr.bf16.mxu1 %v4757_v5  ;;  %v4805_v4 = vld [vmem:[%s5398_s20 + $0x5e0] sm:$0xff]  }
 0x131   : > { %1714 = vmatmul.mubr.bf16.vlgmr.msra.gmra.mrb[12].mxu0 %v1085_v9  ;;  %v4806_v5 = vld [vmem:[%s5398_s20 + $0x520] sm:$0xff]   ;;  %v4810_v9 = vld [vmem:[%s5398_s20 + $0x528] sm:$0xff]  }
 0x132   : > { %1754 = vmatmul.mubr.bf16.vlgmr.msra.gmra.mrb[12].mxu1 %v1087_v10  ;;  %4154 = vmatpush3.bf16.msra.mxu0 %v4758_v6  ;;  %v4807_v6 = vld [vmem:[%s5398_s20 + $0x5a0] sm:$0xff]   ;;  %v4811_v10 = vld [vmem:[%s5398_s20 + $0x5a8] sm:$0xff]  }
 0x133   : > { %4176 = vmatpush3.bf16.msra.mxu1 %v4759_v11  ;;  %4155 = vmatprep.subr.bf16.mxu0 %v4760_v12  ;;  %v4812_v11 = vld [vmem:[%s5398_s20 + $0x570] sm:$0xff]  }
 0x134   : > { %4177 = vmatprep.subr.bf16.mxu1 %v4761_v15  ;;  %2363 = vmatprep.mubr.bf16.mxu0 %v1812_v17  ;;  %v4813_v12 = vld [vmem:[%s5398_s20 + $0x5f0] sm:$0xff]   ;;  %v4816_v17 = vld [vmem:[%s5398_s20 + $0x578] sm:$0xff]  }
 0x135   : > { %2403 = vmatprep.mubr.bf16.mxu1 %v1814_v18  ;;  %v4814_v15 = vld [vmem:[%s5398_s20 + $0x530] sm:$0xff]   ;;  %v4817_v18 = vld [vmem:[%s5398_s20 + $0x5f8] sm:$0xff]  }
 0x136   : > { %4156 = vmatpush3.bf16.msra.mxu0 %v4762_v16  ;;  %v4815_v16 = vld [vmem:[%s5398_s20 + $0x5b0] sm:$0xff]  }
 0x137   : > { %4178 = vmatpush3.bf16.msra.mxu1 %v4763_v57  ;;  %4157 = vmatprep.subr.bf16.mxu0 %v4764_v58  ;;  %v4818_v57 = vld [vmem:[%s5398_s20 + $0x538] sm:$0xff]  }
 0x138   : > { %4179 = vmatprep.subr.bf16.mxu1 %v4765_v19  ;;  %v4819_v58 = vld [vmem:[%s5398_s20 + $0x5b8] sm:$0xff]   ;;  %v1815_v19 = vpack.c.bf16 %v5543_v37, %v5543_v37 }
 0x13a   : > { %4158 = vmatpush3.bf16.msra.mxu0 %v4766_v20  ;;  %v1817_v20 = vpack.c.bf16 %v5546_v46, %v5546_v46 }
 0x13b   : > { %4180 = vmatpush3.bf16.msra.mxu1 %v4767_v21  ;;  %4159 = vmatprep.subr.bf16.mxu0 %v4768_v22 }
 0x13c   : > { %4181 = vmatprep.subr.bf16.mxu1 %v4769_v23 }
 0x13e   : > { %4160 = vmatpush3.bf16.msra.mxu0 %v4770_v24 }
 0x13f   : > { %4182 = vmatpush3.bf16.msra.mxu1 %v4771_v25  ;;  %4161 = vmatprep.subr.bf16.mxu0 %v4772_v26 }
 0x140   : > { %4183 = vmatprep.subr.bf16.mxu1 %v4773_v27 }
 0x142   : > { %4162 = vmatpush3.bf16.msra.mxu0 %v4774_v28 }
 0x143   : > { %4184 = vmatpush3.bf16.msra.mxu1 %v4775_v29  ;;  %4163 = vmatprep.subr.bf16.mxu0 %v4776_v30 }
 0x144   : > { %4185 = vmatprep.subr.bf16.mxu1 %v4777_v31 }
 0x146   : > { %4164 = vmatpush3.bf16.msra.mxu0 %v4778_v32 }
 0x147   : > { %4186 = vmatpush3.bf16.msra.mxu1 %v4779_v33  ;;  %4165 = vmatprep.subr.bf16.mxu0 %v4780_v34 }
 0x148   : > { %4187 = vmatprep.subr.bf16.mxu1 %v4781_v38 }
 0x14a   : > { %4166 = vmatpush3.bf16.msra.mxu0 %v4782_v39 }
 0x14b   : > { %4188 = vmatpush3.bf16.msra.mxu1 %v4783_v36  ;;  %4167 = vmatprep.subr.bf16.mxu0 %v4784_v40 }
 0x14c   : > { %4189 = vmatprep.subr.bf16.mxu1 %v4785_v41 }
 0x14e   : > { %4168 = vmatpush3.bf16.msra.mxu0 %v4786_v42 }
 0x14f   : > { %4190 = vmatpush3.bf16.msra.mxu1 %v4787_v43  ;;  %4197 = vmatprep.subr.bf16.mxu0 %v4788_v44 }
 0x150   : > { %4219 = vmatprep.subr.bf16.mxu1 %v4789_v45 }
 0x151   : > { %2364 = vmatmul.mubr.bf16.vlgmr.msra.gmra.mrb[16].mxu0 %v1811_v50 }
 0x152   : > { %2404 = vmatmul.mubr.bf16.vlgmr.msra.gmra.mrb[16].mxu1 %v1813_v51  ;;  %4198 = vmatpush3.bf16.msra.mxu0 %v4790_v47 }
 0x153   : > { %4220 = vmatpush3.bf16.msra.mxu1 %v4791_v53  ;;  %4199 = vmatprep.subr.bf16.mxu0 %v4792_v54 }
 0x154   : > { %4221 = vmatprep.subr.bf16.mxu1 %v4793_v52  ;;  %2443 = vmatprep.mubr.bf16.mxu0 %v1816_v60 }
 0x155   : > { %2483 = vmatprep.mubr.bf16.mxu1 %v1818_v61 }
 0x156   : > { %4200 = vmatpush3.bf16.msra.mxu0 %v4794_v59 }
 0x157   : > { %4222 = vmatpush3.bf16.msra.mxu1 %v4795_v13  ;;  %4201 = vmatprep.subr.bf16.mxu0 %v4796_v14 }
 0x158   : > { %4223 = vmatprep.subr.bf16.mxu1 %v4797_v62 }
 0x15a   : > { %4202 = vmatpush3.bf16.msra.mxu0 %v4798_v63 }
 0x15b   : > { %4224 = vmatpush3.bf16.msra.mxu1 %v4799_v55  ;;  %4203 = vmatprep.subr.bf16.mxu0 %v4800_v56 }
 0x15c   : > { %4225 = vmatprep.subr.bf16.mxu1 %v4801_v0  ;;  %v301_v0 = vld [vmem:[#allocation2] sm:$0x3] }
 0x15e   : > { %4204 = vmatpush3.bf16.msra.mxu0 %v4802_v1 }
 0x15f   : > { %4226 = vmatpush3.bf16.msra.mxu1 %v4803_v2  ;;  %4205 = vmatprep.subr.bf16.mxu0 %v4804_v3 }
 0x160   : > { %4227 = vmatprep.subr.bf16.mxu1 %v4805_v4 }
 0x162   : > { %4206 = vmatpush3.bf16.msra.mxu0 %v4806_v5 }
 0x163   : > { %4228 = vmatpush3.bf16.msra.mxu1 %v4807_v6  ;;  %4207 = vmatprep.subr.bf16.mxu0 %v4808_v7 }
 0x164   : > { %4229 = vmatprep.subr.bf16.mxu1 %v4809_v8 }
 0x166   : > { %4208 = vmatpush3.bf16.msra.mxu0 %v4810_v9 }
 0x167   : > { %4230 = vmatpush3.bf16.msra.mxu1 %v4811_v10  ;;  %4209 = vmatprep.subr.bf16.mxu0 %v4812_v11 }
 0x168   : > { %4231 = vmatprep.subr.bf16.mxu1 %v4813_v12 }
 0x16a   : > { %4210 = vmatpush3.bf16.msra.mxu0 %v4814_v15 }
 0x16b   : > { %4232 = vmatpush3.bf16.msra.mxu1 %v4815_v16  ;;  %4211 = vmatprep.subr.bf16.mxu0 %v4816_v17 }
 0x16c   : > { %4233 = vmatprep.subr.bf16.mxu1 %v4817_v18 }
 0x16e   : > { %4212 = vmatpush3.bf16.msra.mxu0 %v4818_v57 }
 0x16f   : > { %4234 = vmatpush3.bf16.msra.mxu1 %v4819_v58 }
 0x171   : > { %2444 = vmatmul.mubr.bf16.vlgmr.msra.gmra.mrb[20].mxu0 %v1815_v19 }
 0x172   : > { %2484 = vmatmul.mubr.bf16.vlgmr.msra.gmra.mrb[20].mxu1 %v1817_v20 }
 0x1a4   : > { %v3993_v21 = vpop.f32.mrb[0].mxu0 }
 0x1a5   : > { %v4015_v22 = vpop.f32.mrb[0].mxu1  ;;  %v3994_v23 = vpop.f32.mrb[1].mxu0 }
 0x1a6   : > { %v4016_v24 = vpop.f32.mrb[1].mxu1  ;;  %v3995_v25 = vadd.f32 %v3994_v23, %v3993_v21  ;;  %v3996_v27 = vpop.f32.mrb[2].mxu0 }
 0x1a7   : > { %v4017_v26 = vadd.f32 %v4016_v24, %v4015_v22  ;;  %v4018_v28 = vpop.f32.mrb[2].mxu1  ;;  %v3997_v29 = vpop.f32.mrb[3].mxu0 }
 0x1a8   : > { %v4019_v30 = vpop.f32.mrb[3].mxu1 }
 0x1a9   : > { %v946_v31 = vadd.f32 %v4017_v26, %v3995_v25 }
 0x1c4   : > { %v4037_v32 = vpop.f32.mrb[4].mxu0 }
 0x1c5   : > { %v4059_v37 = vpop.f32.mrb[4].mxu1  ;;  %v4038_v33 = vpop.f32.mrb[5].mxu0 }
 0x1c6   : > { %v4060_v34 = vpop.f32.mrb[5].mxu1  ;;  %v4039_v46 = vadd.f32 %v4038_v33, %v4037_v32  ;;  %v4040_v39 = vpop.f32.mrb[6].mxu0  ;;  %v5134_v32 = vmov (!%p3891_p2), 0.0   ;;  %v4822_v33 = vld [vmem:[#allocation11 + $0x8] sm:$0xff] (!%p3891_p2)  }
 0x1c7   : > { %v4061_v38 = vadd.f32 %v4060_v34, %v4059_v37  ;;  %v4062_v36 = vpop.f32.mrb[6].mxu1  ;;  %v4041_v40 = vpop.f32.mrb[7].mxu0  ;;  %4322 = vmatprep.subr.bf16.mxu1 (!%p3891_p2), %v5134_v32  ;;  %4402 = vmatprep.subr.bf16.mxu0 (!%p3891_p2), %v5134_v32  ;;  %v4821_v37 = vld [vmem:[#allocation11 + $0x100] sm:$0xff] (!%p3891_p2)   ;;  %v4823_v34 = vld [vmem:[#allocation11 + $0x108] sm:$0xff] (!%p3891_p2)   ;;  %v4826_v39 = vld [vmem:[#allocation11 + $0x18] sm:$0xff] (!%p3891_p2)  }
 0x1c8   : > { %v4063_v41 = vpop.f32.mrb[7].mxu1  ;;  %v986_v42 = vadd.f32 %v4039_v46, %v946_v31  ;;  %v4820_v31 = vld [vmem:[#allocation11] sm:$0xff] (!%p3891_p2)   ;;  %4338 = vmatprep.mubr.msk.bf16.mxu1 (!%p3891_p2), %vm5135_vm0, %v5134_v32  ;;  %4403 = vmatpush3.bf16.msra.mxu0 (!%p3891_p2), %v4821_v37  ;;  %v4824_v46 = vld [vmem:[#allocation11 + $0x10] sm:$0xff] (!%p3891_p2)   ;;  %v4827_v36 = vld [vmem:[#allocation11 + $0x118] sm:$0xff] (!%p3891_p2)  }
 0x1c9   : > { %4323 = vmatpush3.bf16.msra.mxu1 (!%p3891_p2), %v4820_v31  ;;  %4404 = vmatprep.subr.bf16.mxu0 (!%p3891_p2), %v5134_v32  ;;  %v4828_v40 = vld [vmem:[#allocation11 + $0x20] sm:$0xff] (!%p3891_p2)   ;;  %v5766_v31 = vstv (!%p3891_p2), %s3899_s14 }
 0x1ca   : > { %v1026_v43 = vadd.f32 %v4061_v38, %v986_v42  ;;  %4324 = vmatprep.subr.bf16.mxu1 (!%p3891_p2), %v5134_v32  ;;  %4418 = vmatprep.mubr.msk.bf16.mxu0 (!%p3891_p2), %vm5135_vm0, %v5134_v32  ;;  %v4825_v38 = vld [vmem:[#allocation11 + $0x110] sm:$0xff] (!%p3891_p2)   ;;  %v4829_v41 = vld [vmem:[#allocation11 + $0x120] sm:$0xff] (!%p3891_p2)   ;;  %v4830_v42 = vld [vmem:[#allocation11 + $0x28] sm:$0xff] (!%p3891_p2)  }
 0x1cc   : > { %v1031_v4 = vadd.f32 %v1026_v43, %v301_v0  ;;  %4405 = vmatpush3.bf16.msra.mxu0 (!%p3891_p2), %v4823_v34  ;;  %v2498_v43 = vld [vmem:[#allocation10] sm:$0x1] (!%p3891_p2) }
 0x1cd   : > { %4325 = vmatpush3.bf16.msra.mxu1 (!%p3891_p2), %v4822_v33  ;;  %4406 = vmatprep.subr.bf16.mxu0 (!%p3891_p2), %v5134_v32 }
 0x1ce   : > { %4326 = vmatprep.subr.bf16.mxu1 (!%p3891_p2), %v5134_v32 }
 0x1d0   : > { %4407 = vmatpush3.bf16.msra.mxu0 (!%p3891_p2), %v4825_v38 }
 0x1d1   : > { %4327 = vmatpush3.bf16.msra.mxu1 (!%p3891_p2), %v4824_v46  ;;  %4408 = vmatprep.subr.bf16.mxu0 (!%p3891_p2), %v5134_v32 }
 0x1d2   : > { %4328 = vmatprep.subr.bf16.mxu1 (!%p3891_p2), %v5134_v32 }
 0x1d4   : > { %4409 = vmatpush3.bf16.msra.mxu0 (!%p3891_p2), %v4827_v36  ;;  %v2567_v36 = vsub.s32 (!%p3891_p2), 0, %v5454_v35  ;;  %v4864_v35 = vld [vmem:[#allocation11 + $0xb0] sm:$0xff] (!%p3891_p2)  }
 0x1d5   : > { %4329 = vmatpush3.bf16.msra.mxu1 (!%p3891_p2), %v4826_v39  ;;  %4410 = vmatprep.subr.bf16.mxu0 (!%p3891_p2), %v5134_v32 }
 0x1d6   : > { %4330 = vmatprep.subr.bf16.mxu1 (!%p3891_p2), %v5134_v32 }
 0x1d8   : > { %4411 = vmatpush3.bf16.msra.mxu0 (!%p3891_p2), %v4829_v41 }
 0x1d9   : > { %4331 = vmatpush3.bf16.msra.mxu1 (!%p3891_p2), %v4828_v40  ;;  %4412 = vmatprep.subr.bf16.mxu0 (!%p3891_p2), %v5134_v32 }
 0x1da   : > { %4332 = vmatprep.subr.bf16.mxu1 (!%p3891_p2), %v5134_v32 }
 0x1dd   : > { %4333 = vmatpush3.bf16.msra.mxu1 (!%p3891_p2), %v4830_v42 }
 0x1de   : > { %4334 = vmatprep.subr.bf16.mxu1 (!%p3891_p2), %v5134_v32 }
 0x1e4   : > { %v4081_v44 = vpop.f32.mrb[8].mxu0 }
 0x1e5   : > { %v4103_v45 = vpop.f32.mrb[8].mxu1  ;;  %v4082_v47 = vpop.f32.mrb[9].mxu0 }
 0x1e6   : > { %v4104_v48 = vpop.f32.mrb[9].mxu1  ;;  %v4083_v49 = vadd.f32 %v4082_v47, %v4081_v44  ;;  %v4084_v51 = vpop.f32.mrb[10].mxu0  ;;  %v2511_v44 = vld [vmem:[#allocation10] sm:$0x2] (!%p3891_p2)  ;;  %v4831_v47 = vld [vmem:[#allocation11 + $0x128] sm:$0xff] (!%p3891_p2)  }
 0x1e7   : > { %v4105_v50 = vadd.f32 %v4104_v48, %v4103_v45  ;;  %v4106_v53 = vpop.f32.mrb[10].mxu1  ;;  %v4085_v54 = vpop.f32.mrb[11].mxu0  ;;  %v2527_v45 = vld [vmem:[#allocation10] sm:$0x4] (!%p3891_p2)  ;;  %v2499_v48 = vunpack.c.l.bf16 (!%p3891_p2), %v2498_v43  ;;  %4413 = vmatpush3.bf16.msra.mxu0 (!%p3891_p2), %v4831_v47  ;;  %v4836_v47 = vld [vmem:[#allocation11 + $0x40] sm:$0xff] (!%p3891_p2)  }
 0x1e8   : > { %v4107_v52 = vpop.f32.mrb[11].mxu1  ;;  %v2528_v51 = vunpack.c.l.bf16 (!%p3891_p2), %v2527_v45  ;;  %v2543_v53 = vld [vmem:[#allocation10] sm:$0x8] (!%p3891_p2)  ;;  %v2571_v54 = vld [vmem:[#allocation13] sm:$0x1] (!%p3891_p2)  ;;  %4414 = vmatprep.subr.bf16.mxu0 (!%p3891_p2), %v5134_v32 }
 0x1e9   : > { %v1676_v59 = vadd.f32 %v4105_v50, %v4083_v49  ;;  %v4832_v49 = vld [vmem:[#allocation11 + $0x30] sm:$0xff] (!%p3891_p2)   ;;  %v2512_v50 = vunpack.c.l.bf16 (!%p3891_p2), %v2511_v44  ;;  %v5732_v52 = vstv (!%p3891_p2), %s2497_s10 }
 0x1ea   : > { %4335 = vmatpush3.bf16.msra.mxu1 (!%p3891_p2), %v4832_v49  ;;  %v4837_v49 = vld [vmem:[#allocation11 + $0x140] sm:$0xff] (!%p3891_p2)  }
 0x1eb   : > { %4336 = vmatprep.subr.bf16.mxu1 (!%p3891_p2), %v5134_v32 }
 0x204   : > { %v4125_v60 = vpop.f32.mrb[12].mxu0 }
 0x205   : > { %v4147_v61 = vpop.f32.mrb[12].mxu1  ;;  %v4126_v13 = vpop.f32.mrb[13].mxu0 }
 0x206   : > { %v4148_v14 = vpop.f32.mrb[13].mxu1  ;;  %v4127_v62 = vadd.f32 %v4126_v13, %v4125_v60  ;;  %v4128_v55 = vpop.f32.mrb[14].mxu0  ;;  %v2572_v60 = vunpack.c.l.bf16 (!%p3891_p2), %v2571_v54  ;;  %v4833_v13 = vld [vmem:[#allocation11 + $0x130] sm:$0xff] (!%p3891_p2)  }
 0x207   : > { %v4149_v63 = vadd.f32 %v4148_v14, %v4147_v61  ;;  %v4150_v56 = vpop.f32.mrb[14].mxu1  ;;  %v4129_v1 = vpop.f32.mrb[15].mxu0  ;;  %v5736_v61 = vld [vmem:[#allocation13] sm:$0x2] (!%p3891_p2)  ;;  %v2501_v14 = vmul.f32 (!%p3891_p2), %v5732_v52, %v2499_v48  ;;  %v5741_v55 = vstv (!%p3891_p2), %s3894_s22  ;;  %4415 = vmatpush3.bf16.msra.mxu0 (!%p3891_p2), %v4833_v13 }
 0x208   : > { %v4151_v2 = vpop.f32.mrb[15].mxu1  ;;  %v1716_v3 = vadd.f32 %v4127_v62, %v1676_v59  ;;  %v5734_v59 = vstv (!%p3891_p2), %s3892_s21  ;;  %v2521_v0 = vmul.f32 (!%p3891_p2), %v5741_v55, %v2512_v50  ;;  %v5745_v1 = vstv (!%p3891_p2), %s3895_s24  ;;  %4416 = vmatprep.subr.bf16.mxu0 (!%p3891_p2), %v5134_v32 }
 0x209   : > { %v2505_v62 = vmul.f32 (!%p3891_p2), %v5734_v59, %v2499_v48  ;;  %v5747_v2 = vstv (!%p3891_p2), %s3896_s23 }
 0x20a   : > { %v1756_v5 = vadd.f32 %v4149_v63, %v1716_v3  ;;  %v2513_v63 = vstv (!%p3891_p2), %s3893_s15 }
 0x20b   : > { %v2514_v56 = vmul.f32 (!%p3891_p2), %v2513_v63, %v2512_v50  ;;  %v2507_v3 = vrot.slane (!%p3891_p2), %v2505_v62, 1  ;;  %v4839_v62 = vld [vmem:[#allocation11 + $0x148] sm:$0xff] (!%p3891_p2)  }
 0x20c   : > { %v1761_v6 = vadd.f32 %v1756_v5, %v1031_v4  ;;  %v2530_v4 = vmul.f32 (!%p3891_p2), %v5745_v1, %v2528_v51  ;;  %v2544_v5 = vunpack.c.l.bf16 (!%p3891_p2), %v2543_v53 }
 0x224   : > { %v4169_v7 = vpop.f32.mrb[16].mxu0 }
 0x225   : > { %v4191_v8 = vpop.f32.mrb[16].mxu1  ;;  %v4170_v9 = vpop.f32.mrb[17].mxu0 }
 0x226   : > { %v4192_v10 = vpop.f32.mrb[17].mxu1  ;;  %v4171_v11 = vadd.f32 %v4170_v9, %v4169_v7  ;;  %v4172_v15 = vpop.f32.mrb[18].mxu0  ;;  %v4834_v7 = vld [vmem:[#allocation11 + $0x38] sm:$0xff] (!%p3891_p2)   ;;  %v5752_v9 = vstv (!%p3891_p2), %s5727_s26 }
 0x227   : > { %v4193_v12 = vadd.f32 %v4192_v10, %v4191_v8  ;;  %v4194_v16 = vpop.f32.mrb[18].mxu1  ;;  %v4173_v17 = vpop.f32.mrb[19].mxu0  ;;  %v2516_v8 = vrot.slane (!%p3891_p2), %v2514_v56, 2  ;;  %v4835_v10 = vld [vmem:[#allocation11 + $0x138] sm:$0xff] (!%p3891_p2)   ;;  %v2537_v15 = vmul.f32 (!%p3891_p2), %v5747_v2, %v2528_v51  ;;  %4337 = vmatpush3.bf16.msra.mxu1 (!%p3891_p2), %v4834_v7  ;;  %v4840_v56 = vld [vmem:[#allocation11 + $0x50] sm:$0xff] (!%p3891_p2)   ;;  %v4846_v7 = vld [vmem:[#allocation11 + $0x68] sm:$0xff] (!%p3891_p2)  }
 0x228   : > { %v4195_v18 = vpop.f32.mrb[19].mxu1  ;;  %v5758_v16 = vstv (!%p3891_p2), %s5730_s27  ;;  %v2559_v17 = vld [vmem:[#allocation10 + $0x4] sm:$0x1] (!%p3891_p2)  ;;  %4417 = vmatpush3.bf16.msra.mxu0 (!%p3891_p2), %v4835_v10  ;;  %4342 = vmatprep.subr.bf16.mxu1 (!%p3891_p2), %v5134_v32  ;;  %v4848_v10 = vld [vmem:[#allocation11 + $0x70] sm:$0xff] (!%p3891_p2)  }
 0x229   : > { %v2406_v57 = vadd.f32 %v4193_v12, %v4171_v11  ;;  %v2509_v11 = vadd.f32 (!%p3891_p2), %v2507_v3, %v2501_v14  ;;  %v2523_v12 = vrot.slane (!%p3891_p2), %v2521_v0, 3  ;;  %v2573_v18 = vmul.f32 (!%p3891_p2), %v2572_v60, %v5732_v52  ;;  %4422 = vmatprep.subr.bf16.mxu0 (!%p3891_p2), %v5134_v32  ;;  %v4841_v3 = vld [vmem:[#allocation11 + $0x150] sm:$0xff] (!%p3891_p2)  }
 0x244   : > { %v4213_v58 = vpop.f32.mrb[20].mxu0 }
 0x245   : > { %v4235_v19 = vpop.f32.mrb[20].mxu1  ;;  %v4214_v20 = vpop.f32.mrb[21].mxu0 }
 0x246   : > { %v4236_v21 = vpop.f32.mrb[21].mxu1  ;;  %v4215_v22 = vadd.f32 %v4214_v20, %v4213_v58  ;;  %v4216_v24 = vpop.f32.mrb[22].mxu0  ;;  %v2518_v58 = vadd.f32 (!%p3891_p2), %v2516_v8, %v2509_v11  ;;  %v2546_v20 = vmul.f32 (!%p3891_p2), %v5752_v9, %v2544_v5  ;;  %v4847_v8 = vld [vmem:[#allocation11 + $0x168] sm:$0xff] (!%p3891_p2)   ;;  %v4849_v11 = vld [vmem:[#allocation11 + $0x170] sm:$0xff] (!%p3891_p2)  }
 0x247   : > { %v4237_v23 = vadd.f32 %v4236_v21, %v4235_v19  ;;  %v4238_v25 = vpop.f32.mrb[22].mxu1  ;;  %v4217_v26 = vpop.f32.mrb[23].mxu0  ;;  %v2532_v19 = vrot.slane (!%p3891_p2), %v2530_v4, 4  ;;  %v2539_v24 = vrot.slane (!%p3891_p2), %v2537_v15, 5  ;;  %v4843_v4 = vld [vmem:[#allocation11 + $0x158] sm:$0xff] (!%p3891_p2)  }
 0x248   : > { %v4239_v27 = vpop.f32.mrb[23].mxu1  ;;  %v2446_v28 = vadd.f32 %v4215_v22, %v2406_v57  ;;  %2496 = sbr.rel (%p3891_p2) target bundleno = 951 (0x3b7), region = 68  ;;  %v2575_v57 = vmul.f32 (!%p3891_p2), %v2572_v60, %v5734_v59  ;;  %v2553_v25 = vmul.f32 (!%p3891_p2), %v5758_v16, %v2544_v5  ;;  %v4844_v5 = vld [vmem:[#allocation11 + $0x60] sm:$0xff] (!%p3891_p2)   ;;  %v4850_v15 = vld [vmem:[#allocation11 + $0x78] sm:$0xff] (!%p3891_p2)  }
 0x24a   : > { %v2486_v29 = vadd.f32 %v4237_v23, %v2446_v28  ;;  %v2577_v22 = vrot.slane (!%p3891_p2), %v2575_v57, 1  ;;  %v2525_v23 = vadd.f32 (!%p3891_p2), %v2523_v12, %v2518_v58  ;;  %v2555_v34 = vrot.slane (!%p3891_p2), %v2553_v25, 7  ;;  %v2592_v57 = vld [vmem:[#allocation13] sm:$0x4] (!%p3891_p2)  ;;  %v2604_v58 = vld [vmem:[#allocation13] sm:$0x8] (!%p3891_p2) }
 0x24b   : > { %v4852_v25 = vld [vmem:[#allocation11 + $0x80] sm:$0xff] (!%p3891_p2)  }
 0x24c   : > { %v2491_v30 = vadd.f32 %v2486_v29, %v1761_v6  ;;  %v2581_v6 = vunpack.c.l.bf16 (!%p3891_p2), %v5736_v61  ;;  %v2579_v27 = vadd.f32 (!%p3891_p2), %v2577_v22, %v2573_v18  ;;  %v2534_v28 = vadd.f32 (!%p3891_p2), %v2532_v19, %v2525_v23  ;;  %v4851_v18 = vld [vmem:[#allocation11 + $0x178] sm:$0xff] (!%p3891_p2)  }
 0x24d   : > { %v2548_v29 = vrot.slane (!%p3891_p2), %v2546_v20, 6  ;;  %v2593_v19 = vunpack.c.l.bf16 (!%p3891_p2), %v2592_v57  ;;  %v2605_v20 = vunpack.c.l.bf16 (!%p3891_p2), %v2604_v58  ;;  %v4885_v57 = vld [vmem:[#allocation11 + $0x208] sm:$0xff] (!%p3891_p2)   ;;  %v4886_v58 = vld [vmem:[#allocation11 + $0x210] sm:$0xff] (!%p3891_p2)  }
 0x24e   : > { %2492 = vst [vmem:[#allocation2] sm:$0x3] %v2491_v30  ;;  %v2582_v21 = vmul.f32 (!%p3891_p2), %v2581_v6, %v2513_v63  ;;  %v2560_v30 = vunpack.c.l.bf16 (!%p3891_p2), %v2559_v17  ;;  %v2541_v33 = vadd.f32 (!%p3891_p2), %v2539_v24, %v2534_v28  ;;  %v2587_v14 = vmul.f32 (!%p3891_p2), %v2581_v6, %v5741_v55  ;;  %v4845_v6 = vld [vmem:[#allocation11 + $0x160] sm:$0xff] (!%p3891_p2)  }
 0x24f   : > { %v2594_v23 = vmul.f32 %v2593_v19, %v5745_v1  ;;  %v2606_v24 = vmul.f32 %v2605_v20, %v5752_v9 }
 0x250   : > { %v2584_v26 = vrot.slane %v2582_v21, 2  ;;  %v2550_v46 = vadd.f32 %v2548_v29, %v2541_v33  ;;  %v2562_v38 = vmul.f32 %v5766_v31, %v2560_v30  ;;  %v2611_v30 = vmul.f32 %v2605_v20, %v5758_v16  ;;  %v4855_v33 = vld [vmem:[#allocation11 + $0x188] sm:$0xff]   ;;  %v4890_v20 = vld [vmem:[#allocation11 + $0x230] sm:$0xff]  }
 0x251   : > { %v2596_v28 = vrot.slane %v2594_v23, 4 }
 0x252   : > { %v2586_v37 = vadd.f32 %v2584_v26, %v2579_v27  ;;  %v2557_v39 = vadd.f32 %v2555_v34, %v2550_v46  ;;  %v4853_v26 = vld [vmem:[#allocation11 + $0x180] sm:$0xff]   ;;  %v2613_v46 = vrot.slane %v2611_v30, 7 }
 0x253   : > { %v2616_v27 = vld [vmem:[#allocation13 + $0x4] sm:$0x1] }
 0x254   : > { %v2563_v40 = vadd.f32 %v2562_v38, %v2557_v39  ;;  %v4856_v39 = vld [vmem:[#allocation11 + $0x90] sm:$0xff]  }
 0x255   : > { %v2564_v41 = vld [vmem:[#allocation2] sm:$0x3] }
 0x256   : > { %v2568_v42 = vrot.slane %v2563_v40, %v2567_v36  ;;  %v4857_v40 = vld [vmem:[#allocation11 + $0x190] sm:$0xff]  }
 0x258   : > { %v2569_v43 = vadd.f32 %v2568_v42, %v2564_v41 }
 0x25a   : > { %v2570_v44 = vmax.f32 %v2569_v43, 0.0  ;;  %v4858_v43 = vld [vmem:[#allocation11 + $0x98] sm:$0xff]  }
 0x25c   : > { %v2620_v45 = vmul.f32 %v2570_v44, %v5732_v52  ;;  %v3052_v48 = vmul.f32 %v2570_v44, %v5745_v1  ;;  %v5774_v50 = vmul.f32 %v2570_v44, %v2513_v63  ;;  %v5777_v51 = vmul.f32 %v2570_v44, %v5752_v9  ;;  %v4838_v52 = vld [vmem:[#allocation11 + $0x48] sm:$0xff]  }
 0x25d   : > { %v5780_v53 = vmul.f32 %v2570_v44, %v5741_v55  ;;  %v5783_v54 = vmul.f32 %v2570_v44, %v5758_v16  ;;  %v5786_v13 = vmul.f32 %v2570_v44, %v5766_v31  ;;  %v2589_v63 = vrot.slane %v2587_v14, 3  ;;  %v4842_v55 = vld [vmem:[#allocation11 + $0x58] sm:$0xff]   ;;  %v4854_v9 = vld [vmem:[#allocation11 + $0x88] sm:$0xff]  }
 0x25e   : > { %v2621_v60 = vpack.c.bf16 %v2620_v45, %v2620_v45  ;;  %v3053_v61 = vpack.c.bf16 %v3052_v48, %v3052_v48  ;;  %v2731_v12 = vmul.f32 %v2570_v44, %v5734_v59  ;;  %v3159_v17 = vmul.f32 %v2570_v44, %v5747_v2  ;;  %v4859_v44 = vld [vmem:[#allocation11 + $0x198] sm:$0xff]   ;;  %v4860_v45 = vld [vmem:[#allocation11 + $0xa0] sm:$0xff]   ;;  %v4862_v48 = vld [vmem:[#allocation11 + $0xa8] sm:$0xff]  }
 0x25f   : > { %v2591_v0 = vadd.f32 %v2589_v63, %v2586_v37  ;;  %v2599_v59 = vmul.f32 %v2593_v19, %v5747_v2  ;;  %v2608_v37 = vrot.slane %v2606_v24, 6  ;;  %v2617_v2 = vunpack.c.l.bf16 %v2616_v27  ;;  %v4869_v63 = vld [vmem:[#allocation11 + $0x1c0] sm:$0xff]   ;;  %v4889_v19 = vld [vmem:[#allocation11 + $0x228] sm:$0xff]  }
 0x260   : > { %4339 = vmatmul.mubr.bf16.vlgmr.msra.gmra.mrb[0].mxu1 %v2621_v60  ;;  %4419 = vmatmul.mubr.bf16.vlgmr.msra.gmra.mrb[0].mxu0 %v3053_v61  ;;  %v2732_v21 = vpack.c.bf16 %v2731_v12, %v2731_v12  ;;  %v3160_v22 = vpack.c.bf16 %v3159_v17, %v3159_v17  ;;  %v4866_v60 = vld [vmem:[#allocation11 + $0xb8] sm:$0xff]   ;;  %v3267_v14 = vpack.c.bf16 %v5777_v51, %v5777_v51  ;;  %v4873_v51 = vld [vmem:[#allocation11 + $0x1d0] sm:$0xff]  }
 0x261   : > { %4343 = vmatpush3.bf16.msra.mxu1 %v4836_v47  ;;  %4423 = vmatpush3.bf16.msra.mxu0 %v4837_v49  ;;  %v2601_v29 = vrot.slane %v2599_v59, 5  ;;  %v2598_v1 = vadd.f32 %v2596_v28, %v2591_v0  ;;  %v2618_v38 = vmul.f32 %v2617_v2, %v5766_v31  ;;  %v4861_v47 = vld [vmem:[#allocation11 + $0x1a0] sm:$0xff]   ;;  %v4863_v49 = vld [vmem:[#allocation11 + $0x1a8] sm:$0xff]   ;;  %v4867_v61 = vld [vmem:[#allocation11 + $0x1b8] sm:$0xff]   ;;  %v3374_v17 = vpack.c.bf16 %v5783_v54, %v5783_v54 }
 0x262   : > { %4344 = vmatprep.subr.bf16.mxu1 %v5134_v32  ;;  %4424 = vmatprep.subr.bf16.mxu0 %v5134_v32  ;;  %v4871_v0 = vld [vmem:[#allocation11 + $0x1c8] sm:$0xff]   ;;  %v4883_v12 = vld [vmem:[#allocation11 + $0x1f8] sm:$0xff]   ;;  %v4888_v54 = vld [vmem:[#allocation11 + $0x220] sm:$0xff]  }
 0x263   : > { %4358 = vmatprep.mubr.msk.bf16.mxu1 %vm5135_vm0, %v5134_v32  ;;  %4438 = vmatprep.mubr.msk.bf16.mxu0 %vm5135_vm0, %v5134_v32  ;;  %v2603_v34 = vadd.f32 %v2601_v29, %v2598_v1 }
 0x265   : > { %4345 = vmatpush3.bf16.msra.mxu1 %v4838_v52  ;;  %4425 = vmatpush3.bf16.msra.mxu0 %v4839_v62  ;;  %v2610_v16 = vadd.f32 %v2608_v37, %v2603_v34  ;;  %v2839_v52 = vpack.c.bf16 %v5774_v50, %v5774_v50  ;;  %v4868_v62 = vld [vmem:[#allocation11 + $0xc0] sm:$0xff]   ;;  %v4872_v50 = vld [vmem:[#allocation11 + $0xd0] sm:$0xff]  }
 0x266   : > { %4346 = vmatprep.subr.bf16.mxu1 %v5134_v32  ;;  %4426 = vmatprep.subr.bf16.mxu0 %v5134_v32 }
 0x267   : > { %v2615_v41 = vadd.f32 %v2613_v46, %v2610_v16 }
 0x269   : > { %4347 = vmatpush3.bf16.msra.mxu1 %v4840_v56  ;;  %4427 = vmatpush3.bf16.msra.mxu0 %v4841_v3  ;;  %v2619_v42 = vadd.f32 %v2618_v38, %v2615_v41  ;;  %v4870_v56 = vld [vmem:[#allocation11 + $0xc8] sm:$0xff]   ;;  %v4874_v3 = vld [vmem:[#allocation11 + $0xd8] sm:$0xff]  }
 0x26a   : > { %4348 = vmatprep.subr.bf16.mxu1 %v5134_v32  ;;  %4428 = vmatprep.subr.bf16.mxu0 %v5134_v32 }
 0x26b   : > { %v5828_v31 = vrot.slane %v2619_v42, %v2567_v36  ;;  %v4865_v36 = vld [vmem:[#allocation11 + $0x1b0] sm:$0xff]  }
 0x26d   : > { %4349 = vmatpush3.bf16.msra.mxu1 %v4842_v55  ;;  %4429 = vmatpush3.bf16.msra.mxu0 %v4843_v4  ;;  %v4875_v55 = vld [vmem:[#allocation11 + $0x1d8] sm:$0xff]   ;;  %v4876_v4 = vld [vmem:[#allocation11 + $0xe0] sm:$0xff]  }
 0x26e   : > { %4350 = vmatprep.subr.bf16.mxu1 %v5134_v32  ;;  %4430 = vmatprep.subr.bf16.mxu0 %v5134_v32 }
 0x271   : > { %4351 = vmatpush3.bf16.msra.mxu1 %v4844_v5  ;;  %4431 = vmatpush3.bf16.msra.mxu0 %v4845_v6  ;;  %v4877_v5 = vld [vmem:[#allocation11 + $0x1e0] sm:$0xff]   ;;  %v4878_v6 = vld [vmem:[#allocation11 + $0xe8] sm:$0xff]  }
 0x272   : > { %4352 = vmatprep.subr.bf16.mxu1 %v5134_v32  ;;  %4432 = vmatprep.subr.bf16.mxu0 %v5134_v32 }
 0x275   : > { %4353 = vmatpush3.bf16.msra.mxu1 %v4846_v7  ;;  %4433 = vmatpush3.bf16.msra.mxu0 %v4847_v8  ;;  %v4879_v7 = vld [vmem:[#allocation11 + $0x1e8] sm:$0xff]   ;;  %v4880_v8 = vld [vmem:[#allocation11 + $0xf0] sm:$0xff]  }
 0x276   : > { %4354 = vmatprep.subr.bf16.mxu1 %v5134_v32  ;;  %4434 = vmatprep.subr.bf16.mxu0 %v5134_v32 }
 0x279   : > { %4355 = vmatpush3.bf16.msra.mxu1 %v4848_v10  ;;  %4435 = vmatpush3.bf16.msra.mxu0 %v4849_v11  ;;  %v4881_v10 = vld [vmem:[#allocation11 + $0x1f0] sm:$0xff]   ;;  %v4882_v11 = vld [vmem:[#allocation11 + $0xf8] sm:$0xff]  }
 0x27a   : > { %4356 = vmatprep.subr.bf16.mxu1 %v5134_v32  ;;  %4436 = vmatprep.subr.bf16.mxu0 %v5134_v32 }
 0x27d   : > { %4357 = vmatpush3.bf16.msra.mxu1 %v4850_v15  ;;  %4437 = vmatpush3.bf16.msra.mxu0 %v4851_v18  ;;  %v2946_v15 = vpack.c.bf16 %v5780_v53, %v5780_v53  ;;  %v4884_v18 = vld [vmem:[#allocation11 + $0x200] sm:$0xff]   ;;  %v4887_v53 = vld [vmem:[#allocation11 + $0x218] sm:$0xff]  }
 0x27e   : > { %4362 = vmatprep.subr.bf16.mxu1 %v5134_v32  ;;  %4442 = vmatprep.subr.bf16.mxu0 %v5134_v32 }
 0x280   : > { %4359 = vmatmul.mubr.bf16.vlgmr.msra.gmra.mrb[0].mxu1 %v2732_v21  ;;  %4439 = vmatmul.mubr.bf16.vlgmr.msra.gmra.mrb[0].mxu0 %v3160_v22  ;;  %v4891_v21 = vld [vmem:[#allocation11 + $0x238] sm:$0xff]   ;;  %v3481_v22 = vpack.c.bf16 %v5786_v13, %v5786_v13 }
 0x281   : > { %4363 = vmatpush3.bf16.msra.mxu1 %v4852_v25  ;;  %4443 = vmatpush3.bf16.msra.mxu0 %v4853_v26 }
 0x282   : > { %4364 = vmatprep.subr.bf16.mxu1 %v5134_v32  ;;  %4444 = vmatprep.subr.bf16.mxu0 %v5134_v32 }
 0x283   : > { %4378 = vmatprep.mubr.msk.bf16.mxu1 %vm5135_vm0, %v5134_v32  ;;  %4458 = vmatprep.mubr.msk.bf16.mxu0 %vm5135_vm0, %v5134_v32 }
 0x285   : > { %4365 = vmatpush3.bf16.msra.mxu1 %v4854_v9  ;;  %4445 = vmatpush3.bf16.msra.mxu0 %v4855_v33 }
 0x286   : > { %4366 = vmatprep.subr.bf16.mxu1 %v5134_v32  ;;  %4446 = vmatprep.subr.bf16.mxu0 %v5134_v32 }
 0x289   : > { %4367 = vmatpush3.bf16.msra.mxu1 %v4856_v39  ;;  %4447 = vmatpush3.bf16.msra.mxu0 %v4857_v40 }
 0x28a   : > { %4368 = vmatprep.subr.bf16.mxu1 %v5134_v32  ;;  %4448 = vmatprep.subr.bf16.mxu0 %v5134_v32 }
 0x28d   : > { %4369 = vmatpush3.bf16.msra.mxu1 %v4858_v43  ;;  %4449 = vmatpush3.bf16.msra.mxu0 %v4859_v44 }
 0x28e   : > { %4370 = vmatprep.subr.bf16.mxu1 %v5134_v32  ;;  %4450 = vmatprep.subr.bf16.mxu0 %v5134_v32 }
 0x291   : > { %4371 = vmatpush3.bf16.msra.mxu1 %v4860_v45  ;;  %4451 = vmatpush3.bf16.msra.mxu0 %v4861_v47 }
 0x292   : > { %4372 = vmatprep.subr.bf16.mxu1 %v5134_v32  ;;  %4452 = vmatprep.subr.bf16.mxu0 %v5134_v32 }
 0x295   : > { %4373 = vmatpush3.bf16.msra.mxu1 %v4862_v48  ;;  %4453 = vmatpush3.bf16.msra.mxu0 %v4863_v49 }
 0x296   : > { %4374 = vmatprep.subr.bf16.mxu1 %v5134_v32  ;;  %4454 = vmatprep.subr.bf16.mxu0 %v5134_v32 }
 0x299   : > { %4375 = vmatpush3.bf16.msra.mxu1 %v4864_v35  ;;  %4455 = vmatpush3.bf16.msra.mxu0 %v4865_v36 }
 0x29a   : > { %4376 = vmatprep.subr.bf16.mxu1 %v5134_v32  ;;  %4456 = vmatprep.subr.bf16.mxu0 %v5134_v32 }
 0x29d   : > { %4377 = vmatpush3.bf16.msra.mxu1 %v4866_v60  ;;  %4457 = vmatpush3.bf16.msra.mxu0 %v4867_v61 }
 0x29e   : > { %4382 = vmatprep.subr.bf16.mxu1 %v5134_v32  ;;  %4462 = vmatprep.subr.bf16.mxu0 %v5134_v32 }
 0x2a0   : > { %4379 = vmatmul.mubr.bf16.vlgmr.msra.gmra.mrb[0].mxu1 %v2839_v52  ;;  %4459 = vmatmul.mubr.bf16.vlgmr.msra.gmra.mrb[0].mxu0 %v3267_v14 }
 0x2a1   : > { %4383 = vmatpush3.bf16.msra.mxu1 %v4868_v62  ;;  %4463 = vmatpush3.bf16.msra.mxu0 %v4869_v63 }
 0x2a2   : > { %4384 = vmatprep.subr.bf16.mxu1 %v5134_v32  ;;  %4464 = vmatprep.subr.bf16.mxu0 %v5134_v32 }
 0x2a3   : > { %4398 = vmatprep.mubr.msk.bf16.mxu1 %vm5135_vm0, %v5134_v32  ;;  %4478 = vmatprep.mubr.msk.bf16.mxu0 %vm5135_vm0, %v5134_v32 }
 0x2a5   : > { %4385 = vmatpush3.bf16.msra.mxu1 %v4870_v56  ;;  %4465 = vmatpush3.bf16.msra.mxu0 %v4871_v0 }
 0x2a6   : > { %4386 = vmatprep.subr.bf16.mxu1 %v5134_v32  ;;  %4466 = vmatprep.subr.bf16.mxu0 %v5134_v32 }
 0x2a9   : > { %4387 = vmatpush3.bf16.msra.mxu1 %v4872_v50  ;;  %4467 = vmatpush3.bf16.msra.mxu0 %v4873_v51 }
 0x2aa   : > { %4388 = vmatprep.subr.bf16.mxu1 %v5134_v32  ;;  %4468 = vmatprep.subr.bf16.mxu0 %v5134_v32 }
 0x2ad   : > { %4389 = vmatpush3.bf16.msra.mxu1 %v4874_v3  ;;  %4469 = vmatpush3.bf16.msra.mxu0 %v4875_v55 }
 0x2ae   : > { %4390 = vmatprep.subr.bf16.mxu1 %v5134_v32  ;;  %4470 = vmatprep.subr.bf16.mxu0 %v5134_v32 }
 0x2b1   : > { %4391 = vmatpush3.bf16.msra.mxu1 %v4876_v4  ;;  %4471 = vmatpush3.bf16.msra.mxu0 %v4877_v5 }
 0x2b2   : > { %4392 = vmatprep.subr.bf16.mxu1 %v5134_v32  ;;  %4472 = vmatprep.subr.bf16.mxu0 %v5134_v32 }
 0x2b5   : > { %4393 = vmatpush3.bf16.msra.mxu1 %v4878_v6  ;;  %4473 = vmatpush3.bf16.msra.mxu0 %v4879_v7 }
 0x2b6   : > { %4394 = vmatprep.subr.bf16.mxu1 %v5134_v32  ;;  %4474 = vmatprep.subr.bf16.mxu0 %v5134_v32 }
 0x2b9   : > { %4395 = vmatpush3.bf16.msra.mxu1 %v4880_v8  ;;  %4475 = vmatpush3.bf16.msra.mxu0 %v4881_v10 }
 0x2ba   : > { %4396 = vmatprep.subr.bf16.mxu1 %v5134_v32  ;;  %4476 = vmatprep.subr.bf16.mxu0 %v5134_v32 }
 0x2bd   : > { %4397 = vmatpush3.bf16.msra.mxu1 %v4882_v11  ;;  %4477 = vmatpush3.bf16.msra.mxu0 %v4883_v12 }
 0x2be   : > { %4482 = vmatprep.subr.bf16.mxu0 %v5134_v32 }
 0x2c0   : > { %4399 = vmatmul.mubr.bf16.vlgmr.msra.gmra.mrb[0].mxu1 %v2946_v15  ;;  %4479 = vmatmul.mubr.bf16.vlgmr.msra.gmra.mrb[0].mxu0 %v3374_v17 }
 0x2c1   : > { %4483 = vmatpush3.bf16.msra.mxu0 %v4884_v18  ;;  %4498 = vmatprep.mubr.msk.bf16.mxu0 %vm5135_vm0, %v5134_v32 }
 0x2c2   : > { %4484 = vmatprep.subr.bf16.mxu0 %v5134_v32 }
 0x2c5   : > { %4485 = vmatpush3.bf16.msra.mxu0 %v4885_v57 }
 0x2c6   : > { %4486 = vmatprep.subr.bf16.mxu0 %v5134_v32 }
 0x2c9   : > { %4487 = vmatpush3.bf16.msra.mxu0 %v4886_v58 }
 0x2ca   : > { %4488 = vmatprep.subr.bf16.mxu0 %v5134_v32 }
 0x2cd   : > { %4489 = vmatpush3.bf16.msra.mxu0 %v4887_v53 }
 0x2ce   : > { %4490 = vmatprep.subr.bf16.mxu0 %v5134_v32 }
 0x2d1   : > { %4491 = vmatpush3.bf16.msra.mxu0 %v4888_v54 }
 0x2d2   : > { %4492 = vmatprep.subr.bf16.mxu0 %v5134_v32 }
 0x2d5   : > { %4493 = vmatpush3.bf16.msra.mxu0 %v4889_v19 }
 0x2d6   : > { %4494 = vmatprep.subr.bf16.mxu0 %v5134_v32 }
 0x2d9   : > { %4495 = vmatpush3.bf16.msra.mxu0 %v4890_v20 }
 0x2da   : > { %4496 = vmatprep.subr.bf16.mxu0 %v5134_v32 }
 0x2dd   : > { %4497 = vmatpush3.bf16.msra.mxu0 %v4891_v21 }
 0x2e0   : > { %4499 = vmatmul.mubr.bf16.vlgmr.msra.gmra.mrb[0].mxu0 %v3481_v22 }
 0x393   : > { %v3045_v23 = vpop.f32.mrb[0].mxu1 }
 0x394   : > { %v4502_v59 = vadd.f32 %v3045_v23, %v5828_v31  ;;  %v4400_v24 = vpop.f32.mrb[1].mxu1 }
 0x395   : > { %v3048_v25 = vpop.f32.mrb[2].mxu1 }
 0x396   : > { %v4401_v26 = vpop.f32.mrb[3].mxu1 }
 0x3b3   : > { %v3580_v27 = vpop.f32.mrb[0].mxu0 }
 0x3b4   : > { %v4503_v28 = vadd.f32 %v4502_v59, %v3580_v27  ;;  %v4500_v29 = vpop.f32.mrb[1].mxu0 }
 0x3b5   : > { %v3583_v30 = vpop.f32.mrb[2].mxu0 }
 0x3b6   : > { %3587 = vst [vmem:[#allocation14] sm:$0x3] %v4503_v28  ;;  %v4501_v1 = vpop.f32.mrb[3].mxu0 }
 0x3b7 PF: > { %p4582_p11 = scmp.eq.s32.totalorder %s5203_s0, 2  ;;  %s5136_s28 = smov [#allocation14]  }
 0x3b8   : > { %s3595_s7 = sshll.u32 %s5136_s28, 4  ;;  %s3596_s7 = int_to_ptr.vmem [resolvable:$true] %s3595_s7 }
 0x3b9   : > { %s5044_s16 = scalar_lea.vmem %s3596_s7, 32  ;;  %p5051_p5 = scmp.lt.s32.totalorder %s3596_s7, %s3596_s7 }
 0x3ba   : > { %p5045_p6 = scmp.ne.s32.totalorder %s3596_s7, %s5044_s16  ;;  %p5052_p10 = scmp.lt.s32.totalorder %s5044_s16, %s5044_s16 }
 0x3bc   : > { %p5046_p12 = pnand %p5045_p6, %p4582_p11  ;;  %p5053_p4 = por %p5052_p10, %p5051_p5 }
 0x3be   : > { %p5047_p0 = pneg %p5046_p12 }
 0x3c0   : > { %p5054_p7 = pnand %p5053_p4, %p5047_p0 }
 0x3c2   : > { %5057 = shalt.err (!%p5054_p7)
}
 0x3c3   : > { %s5058_s11 = scalar_lea.hbm %s5921_s6, 32 }
 0x3c4   : > { %p5059_p3 = scmp.ne.s32.totalorder %s5921_s6, %s5058_s11  ;;  %p5064_p8 = scmp.lt.u32.totalorder %s5058_s11, %s5921_s6 }
 0x3c6   : > { %p5060_p13 = pnand %p5059_p3, %p4582_p11 }
 0x3c8   : > { %p5061_p1 = pneg %p5060_p13 }
 0x3ca   : > { %p5066_p9 = pnand %p5064_p8, %p5061_p1 }
 0x3cc   : > { %5069 = shalt.err (!%p5066_p9)
}
 0x3cd   : > { %4553 = dma.vmem_to_hbm [thread:$0]  (%p4582_p11), %s3596_s7, 32, %s5921_s6, [#allocation7]  }
 0x3ce   : > { %5105 = dma.done.wait (%p4582_p11), [#allocation7], 32  }
 0x3cf   : > { %5107 = vsyncadd (%p4582_p11), [#allocation7], 4294967264 }
 0x3d0 PF: > { %p23_p2 = scmp.ge.s32.totalorder %s5333_s25, 5   ;;  %s5939_s7 = smov %s5114_s8 }
 0x3d1   : > { %s5940_s8 = smov %s5118_s9  ;;  %s5941_s9 = smov %s5343_s17 }
 0x3d2   : > { %s5942_s10 = smov %s5333_s25  ;;  %25 = sbr.rel (!%p23_p2) target bundleno = 18 (0x12), region = 102 }
 0x3d9   :  { %3608 = vsyncpa [#allocation6], 1 }
 0x3da   :  { %3610 = vsyncpa [#allocation6 + $0x1], 1 }
 0x3db   :  { %3611 = vsyncpa [#allocation9], 1 }
 0x3dc   :  { %3613 = vsyncpa [#allocation9 + $0x1], 1 }
 0x3dd   :  { %3614 = vsyncpa [#allocation12], 1 }
 0x3de   :  { %3615 = vsyncpa [#allocation7], 1 }
 0x3df   :  { %3617 = vsyncpa [#allocation7 + $0x1], 1 }

</bundles_post_ra>
